<compile_context>
chip_gen: v6e
topology: v6e:2x2x1
jax: 0.10.0
libtpu: 0.0.40
codegen_flags: <defaults>
</compile_context>

<pallas_src>
import functools

import jax
import jax.numpy as jnp
from jax.experimental import pallas as pl
from jax.experimental.pallas import tpu as pltpu

BN_EPS = 1e-5                              # PyTorch nn.BatchNorm2d default
_VMEM_LIMIT = 32 * 1024 * 1024             # safe on v5e/v6e (128 MiB) and v7x (64 MiB)
_TM_CAP = 256                              # rows per matmul tile
_BN_SINGLE_TILE_BYTES = 4 * 1024 * 1024    # f32 cap for the fused single-tile BN


def _round_up(x, m):
    return (x + m - 1) // m * m


# ----------------------------- Pallas kernels ------------------------------ #

def _matmul_kernel(a_ref, b_ref, o_ref):
    # Full K is resident (num_k == 1): no accumulator scratch, no pl.when gates.
    o_ref[...] = jnp.dot(a_ref[...], b_ref[...],
                         preferred_element_type=jnp.float32)


def _bn_relu_fused_kernel(y_ref, gamma_ref, beta_ref, o_ref, *, inv_m, n_pad):
    """Whole (Mp, Cp) activation in VMEM: training-mode BatchNorm (batch stats)
    + ReLU in one pass.  Padded rows are exactly zero; `n_pad` corrects the
    centered sum of squares so the variance is exact over the true M rows."""
    y = y_ref[...]                                            # (Mp, Cp) f32
    mean = jnp.sum(y, axis=0, keepdims=True) * inv_m
    c = y - mean
    var = (jnp.sum(c * c, axis=0, keepdims=True)
           - n_pad * mean * mean) * inv_m                     # exact centered var
    inv_std = jax.lax.rsqrt(var + BN_EPS)
    scale = gamma_ref[...] * inv_std                          # (1, Cp)
    shift = beta_ref[...] - mean * scale
    o_ref[...] = jnp.maximum(y * scale + shift, 0.0).astype(o_ref.dtype)


def _bn_relu_twopass_kernel(y_ref, gamma_ref, beta_ref, o_ref,
                            sum_ref, sq_ref, scale_ref, shift_ref, *, inv_m):
    """Fallback for activations too large for one tile: grid = (2, num_m);
    pass 0 accumulates per-channel (sum, sum_sq), pass 1 applies scale/shift."""
    p = pl.program_id(0)
    m = pl.program_id(1)

    @pl.when((p == 0) & (m == 0))
    def _():
        sum_ref[...] = jnp.zeros_like(sum_ref)
        sq_ref[...] = jnp.zeros_like(sq_ref)

    @pl.when(p == 0)
    def _():
        y = y_ref[...]
        sum_ref[...] += jnp.sum(y, axis=0, keepdims=True)
        sq_ref[...] += jnp.sum(y * y, axis=0, keepdims=True)
        o_ref[...] = jnp.zeros_like(o_ref)     # placeholder; overwritten in pass 1

    @pl.when((p == 1) & (m == 0))
    def _():
        mean = sum_ref[...] * inv_m
        var = sq_ref[...] * inv_m - mean * mean      # one-pass var (fallback only)
        inv_std = jax.lax.rsqrt(var + BN_EPS)
        scale_ref[...] = gamma_ref[...] * inv_std
        shift_ref[...] = beta_ref[...] - mean * gamma_ref[...] * inv_std

    @pl.when(p == 1)
    def _():
        o_ref[...] = jnp.maximum(
            y_ref[...] * scale_ref[...] + shift_ref[...], 0.0).astype(o_ref.dtype)


def _tanh_kernel(y_ref, o_ref):
    o_ref[...] = jnp.tanh(y_ref[...])


# ------------------------------ Pallas wrappers ----------------------------- #

def _pallas_matmul(a, b):
    """f32 <- bf16(A) @ bf16(B).  A:(M,K)  B:(K,C).  K (<=768) and C (<=4096)
    are small in this model, so B stays fully VMEM-resident (constant block
    index) and no K grid axis / accumulator scratch is needed."""
    M, K = a.shape
    _, C = b.shape
    Kp = _round_up(K, 128)
    Cp = _round_up(C, 128)
    TM = min(_TM_CAP, _round_up(M, 16))
    Mp = _round_up(M, TM)
    num_m = Mp // TM

    a_p = jnp.pad(a.astype(jnp.bfloat16), ((0, Mp - M), (0, Kp - K)))
    b_p = jnp.pad(b.astype(jnp.bfloat16), ((0, Kp - K), (0, Cp - C)))

    cost = pl.CostEstimate(
        flops=2 * Mp * Kp * Cp, transcendentals=0,
        bytes_accessed=a_p.size * 2 + b_p.size * 2 + Mp * Cp * 4)

    out = pl.pallas_call(
        _matmul_kernel,
        out_shape=jax.ShapeDtypeStruct((Mp, Cp), jnp.float32),
        grid=(num_m,),
        in_specs=[
            pl.BlockSpec((TM, Kp), lambda i: (i, 0)),
            pl.BlockSpec((Kp, Cp), lambda i: (0, 0)),   # B resident, fetched once
        ],
        out_specs=pl.BlockSpec((TM, Cp), lambda i: (i, 0)),
        compiler_params=pltpu.CompilerParams(
            dimension_semantics=("parallel",),
            vmem_limit_bytes=_VMEM_LIMIT),
        cost_estimate=cost,
    )(a_p, b_p)
    return out[:M, :C]


def _pallas_bn_relu(y, gamma, beta):
    """Training-mode BatchNorm over rows (per channel) + ReLU.  y:(M,C) f32.
    Returns bf16 (M, C).

    NOTE: correctness of padding relies on zero pads: zero rows add nothing to
    the statistics (true row count M is used for the mean/var), and gamma_p = 0
    kills the rsqrt(eps) blow-up on padded channels."""
    M, C = y.shape
    Cp = _round_up(C, 128)
    gamma_p = jnp.pad(gamma.astype(jnp.float32), (0, Cp - C)).reshape(1, Cp)
    beta_p = jnp.pad(beta.astype(jnp.float32), (0, Cp - C)).reshape(1, Cp)

    Mp = _round_up(M, 16)
    if Mp * Cp * 4 <= _BN_SINGLE_TILE_BYTES:
        y_p = jnp.pad(y, ((0, Mp - M), (0, Cp - C)))
        out = pl.pallas_call(
            functools.partial(_bn_relu_fused_kernel,
                              inv_m=1.0 / M, n_pad=float(Mp - M)),
            out_shape=jax.ShapeDtypeStruct((Mp, Cp), jnp.bfloat16),
            grid=(1,),
            in_specs=[
                pl.BlockSpec((Mp, Cp), lambda i: (0, 0)),
                pl.BlockSpec((1, Cp), lambda i: (0, 0)),
                pl.BlockSpec((1, Cp), lambda i: (0, 0)),
            ],
            out_specs=pl.BlockSpec((Mp, Cp), lambda i: (0, 0)),
            compiler_params=pltpu.CompilerParams(
                dimension_semantics=("arbitrary",),
                vmem_limit_bytes=_VMEM_LIMIT),
        )(y_p, gamma_p, beta_p)
        return out[:M, :C]

    # Fallback (large M): two grid passes inside a single pallas_call.
    TM = _TM_CAP
    Mp = _round_up(M, TM)
    num_m = Mp // TM
    y_p = jnp.pad(y, ((0, Mp - M), (0, Cp - C)))
    out = pl.pallas_call(
        functools.partial(_bn_relu_twopass_kernel, inv_m=1.0 / M),
        out_shape=jax.ShapeDtypeStruct((Mp, Cp), jnp.bfloat16),
        grid=(2, num_m),
        in_specs=[
            pl.BlockSpec((TM, Cp), lambda p, m: (m, 0)),
            pl.BlockSpec((1, Cp), lambda p, m: (0, 0)),
            pl.BlockSpec((1, Cp), lambda p, m: (0, 0)),
        ],
        out_specs=pl.BlockSpec((TM, Cp), lambda p, m: (m, 0)),
        scratch_shapes=[pltpu.VMEM((1, Cp), jnp.float32) for _ in range(4)],
        compiler_params=pltpu.CompilerParams(
            dimension_semantics=("arbitrary", "arbitrary"),
            vmem_limit_bytes=_VMEM_LIMIT),
    )(y_p, gamma_p, beta_p)
    return out[:M, :C]


def _pallas_tanh(y):
    """Elementwise tanh on a lane-dense (rows, 128) view of y (any shape)."""
    shape, total = y.shape, y.size
    lanes = 128
    rows = -(-total // lanes)
    TR = min(512, _round_up(rows, 8))
    rows_p = _round_up(rows, TR)
    flat = jnp.pad(y.reshape(-1), (0, rows_p * lanes - total)).reshape(rows_p, lanes)
    out = pl.pallas_call(
        _tanh_kernel,
        out_shape=jax.ShapeDtypeStruct((rows_p, lanes), jnp.float32),
        grid=(rows_p // TR,),
        in_specs=[pl.BlockSpec((TR, lanes), lambda i: (i, 0))],
        out_specs=pl.BlockSpec((TR, lanes), lambda i: (i, 0)),
        compiler_params=pltpu.CompilerParams(
            dimension_semantics=("parallel",),
            vmem_limit_bytes=_VMEM_LIMIT),
    )(flat)
    return out.reshape(-1)[:total].reshape(shape)


# --------------------------- ConvTranspose2d layer -------------------------- #

def _overlap_add(z, stride, k, pad):
    """Scatter the k*k matmul taps Z:(N,H,W,k,k,C) to their transposed-conv
    output positions.  Pure XLA layout glue: pads, adds, interleave-reshape,
    slice.  Requires k % stride == 0 (true for both layer configs)."""
    assert k % stride == 0
    taps = k // stride

    def expand(u, axis, tap_axis):
        length = u.shape[axis]
        phases = []
        for r in range(stride):
            acc = None
            for t in range(taps):
                v = jax.lax.index_in_dim(u, r + t * stride, axis=tap_axis,
                                         keepdims=False)
                cfg = [(0, 0)] * v.ndim
                cfg[axis] = (t, taps - 1 - t)
                v = jnp.pad(v, cfg)
                acc = v if acc is None else acc + v
            phases.append(acc)
        full = jnp.stack(phases, axis=axis + 1)      # (.., L+taps-1, stride, ..)
        shp = list(full.shape)
        shp[axis] *= stride
        del shp[axis + 1]
        full = full.reshape(shp)                     # interleave phases
        out_len = (length - 1) * stride + k - 2 * pad
        return jax.lax.slice_in_dim(full, pad, pad + out_len, axis=axis)

    z = expand(z, axis=1, tap_axis=3)                # rows (kh consumed)
    z = expand(z, axis=2, tap_axis=3)                # cols (kw consumed)
    return z


def conv_transpose_layer(x, w, stride, pad, gamma=None, beta=None,
                         final_tanh=False):
    """ConvTranspose2d(bias=False) [+ BN(batch stats) + ReLU] or [+ tanh].

    x: (N, H, W, Cin) NHWC bf16.  w: (Cin, Cout, k, k) PyTorch layout (f32).
    Polyphase lowering: one dense Pallas matmul X @ W_flat, then an XLA
    overlap-add of the k*k taps (no zero-dilation, no im2col).
    """
    N, H, W, Cin = x.shape
    _, Cout, k, _ = w.shape

    A = x.reshape(N * H * W, Cin)
    # B columns ordered (kh, kw, cout); no spatial flip in the scatter form.
    B = jnp.transpose(w, (0, 2, 3, 1)).reshape(Cin, k * k * Cout)

    Z = _pallas_matmul(A, B)                         # f32 (N*H*W, k*k*Cout)
    Z = Z.reshape(N, H, W, k, k, Cout)
    Y = _overlap_add(Z, stride, k, pad)              # f32 (N, OH, OW, Cout)
    # TODO(synk): pull the overlap-add (and ultimately the whole layer chain)
    # into one persistent Pallas kernel; all weights/activations fit in VMEM.

    if final_tanh:
        return _pallas_tanh(Y)                       # f32 NHWC
    OH, OW = Y.shape[1], Y.shape[2]
    out = _pallas_bn_relu(Y.reshape(N * OH * OW, Cout), gamma, beta)
    return out.reshape(N, OH, OW, Cout)              # bf16 NHWC


# ------------------------------ model / params ------------------------------ #

def init_params(key, embedding_dim=8, latent_dim=16, filter_num=32):
    cin0 = embedding_dim + latent_dim + 10
    cfgs = [
        # (cin, cout, k, stride, pad, has_bn)
        (cin0, filter_num, 2, 1, 0, True),
        (filter_num, filter_num // 2, 4, 2, 1, True),
        (filter_num // 2, filter_num // 4, 4, 2, 1, True),
        (filter_num // 4, filter_num // 8, 4, 2, 1, True),
        (filter_num // 8, 3, 4, 2, 1, False),
    ]
    params = []
    for (cin, cout, k, s, p, bn) in cfgs:
        key, kw_, kg_ = jax.random.split(key, 3)
        # nn.init.normal_(weight, 0.0, 0.02)
        w = 0.02 * jax.random.normal(kw_, (cin, cout, k, k), jnp.float32)
        if bn:
            # nn.init.normal_(gamma, 1.0, 0.02), beta = 0
            gamma = 1.0 + 0.02 * jax.random.normal(kg_, (cout,), jnp.float32)
            beta = jnp.zeros((cout,), jnp.float32)
        else:
            gamma = beta = None
        params.append(dict(w=w, gamma=gamma, beta=beta, k=k, s=s, p=p, bn=bn))
    return params


def gta_g_forward(x_nchw, params):
    # NHWC end-to-end inside; intermediate activations in bf16.
    x = jnp.transpose(x_nchw, (0, 2, 3, 1)).astype(jnp.bfloat16)
    for lp in params:
        x = conv_transpose_layer(
            x, lp["w"], lp["s"], lp["p"],
            gamma=lp["gamma"], beta=lp["beta"],
            final_tanh=not lp["bn"])
    # final layer output is f32 NHWC -> NCHW to match the PyTorch module
    return jnp.transpose(x, (0, 3, 1, 2))


# ----------------------------------- main ----------------------------------- #

if __name__ == "__main__":
    embedding_dim, latent_dim, filter_num = 8, 16, 32   # small synthetic config
    N = 2
    cin = embedding_dim + latent_dim + 10               # 34

    key = jax.random.PRNGKey(0)
    kx, kp = jax.random.split(key)
    x = jax.random.normal(kx, (N, cin, 1, 1), jnp.float32)   # NCHW, 1x1 spatial
    params = init_params(kp, embedding_dim, latent_dim, filter_num)

    fwd = jax.jit(functools.partial(gta_g_forward, params=params))
    out = jax.block_until_ready(fwd(x))

    assert out.shape == (N, 3, 32, 32), out.shape
    assert bool(jnp.all(jnp.isfinite(out)))
    print("KERNEL_OK")
</pallas_src>

<mosaic_0001>
module attributes {stable_mosaic.version = 11 : i64} {
  func.func @_matmul_kernel(%arg0: i32, %arg1: memref<16x128xbf16, #tpu.memory_space<vmem>>, %arg2: memref<128x128xbf16, #tpu.memory_space<vmem>>, %arg3: memref<16x128xf32, #tpu.memory_space<vmem>>) attributes {dimension_semantics = [#tpu.dimension_semantics<parallel>], iteration_bounds = array<i64: 1>, scalar_prefetch = 0 : i64, scratch_operands = 0 : i64, tpu.core_type = #tpu.core_type<tc>, window_params = [{transform_indices = @transform_0, window_bounds = array<i64: 16, 128>}, {pipeline_mode = #tpu.pipeline_mode<synchronous>, transform_indices = @transform_1, window_bounds = array<i64: 128, 128>}, {transform_indices = @transform_2, window_bounds = array<i64: 16, 128>}]} {
    %c0 = arith.constant 0 : index
    %c0_0 = arith.constant 0 : index
    %0 = vector.load %arg1[%c0, %c0_0] : memref<16x128xbf16, #tpu.memory_space<vmem>>, vector<16x128xbf16>
    %c0_1 = arith.constant 0 : index
    %c0_2 = arith.constant 0 : index
    %1 = vector.load %arg2[%c0_1, %c0_2] : memref<128x128xbf16, #tpu.memory_space<vmem>>, vector<128x128xbf16>
    %cst = arith.constant dense<0.000000e+00> : vector<16x128xf32>
    %2 = tpu.matmul %0, %1, %cst {dimension_numbers = #tpu.dot_dimension_numbers<[1], [0], [0], [1], [0, 0, 1, 1], [], []>} : vector<16x128xbf16>, vector<128x128xbf16>, vector<16x128xf32> -> vector<16x128xf32>
    %c0_3 = arith.constant 0 : index
    %c0_4 = arith.constant 0 : index
    %3 = vector.load %arg3[%c0_3, %c0_4] : memref<16x128xf32, #tpu.memory_space<vmem>>, vector<16x128xf32>
    tpu.vector_store %arg3[%c0_3, %c0_4], %2 {strides = array<i32>} : memref<16x128xf32, #tpu.memory_space<vmem>>, vector<16x128xf32>,
    return
  }
  func.func @transform_0(%arg0: i32) -> (i32, i32) {
    %c0_i32 = arith.constant 0 : i32
    %c0_i32_0 = arith.constant 0 : i32
    return %arg0, %c0_i32 : i32, i32
  }
  func.func @transform_1(%arg0: i32) -> (i32, i32) {
    %c0_i32 = arith.constant 0 : i32
    %c0_i32_0 = arith.constant 0 : i32
    %c0_i32_1 = arith.constant 0 : i32
    return %c0_i32, %c0_i32_0 : i32, i32
  }
  func.func @transform_2(%arg0: i32) -> (i32, i32) {
    %c0_i32 = arith.constant 0 : i32
    %c0_i32_0 = arith.constant 0 : i32
    return %arg0, %c0_i32 : i32, i32
  }
}

module attributes {stable_mosaic.version = 11 : i64} {
  func.func @_matmul_kernel(%arg0: i32, %arg1: memref<16x128xbf16, #tpu.memory_space<vmem>>, %arg2: memref<128x256xbf16, #tpu.memory_space<vmem>>, %arg3: memref<16x256xf32, #tpu.memory_space<vmem>>) attributes {dimension_semantics = [#tpu.dimension_semantics<parallel>], iteration_bounds = array<i64: 1>, scalar_prefetch = 0 : i64, scratch_operands = 0 : i64, tpu.core_type = #tpu.core_type<tc>, window_params = [{transform_indices = @transform_0, window_bounds = array<i64: 16, 128>}, {pipeline_mode = #tpu.pipeline_mode<synchronous>, transform_indices = @transform_1, window_bounds = array<i64: 128, 256>}, {transform_indices = @transform_2, window_bounds = array<i64: 16, 256>}]} {
    %c0 = arith.constant 0 : index
    %c0_0 = arith.constant 0 : index
    %0 = vector.load %arg1[%c0, %c0_0] : memref<16x128xbf16, #tpu.memory_space<vmem>>, vector<16x128xbf16>
    %c0_1 = arith.constant 0 : index
    %c0_2 = arith.constant 0 : index
    %1 = vector.load %arg2[%c0_1, %c0_2] : memref<128x256xbf16, #tpu.memory_space<vmem>>, vector<128x256xbf16>
    %cst = arith.constant dense<0.000000e+00> : vector<16x256xf32>
    %2 = tpu.matmul %0, %1, %cst {dimension_numbers = #tpu.dot_dimension_numbers<[1], [0], [0], [1], [0, 0, 1, 1], [], []>} : vector<16x128xbf16>, vector<128x256xbf16>, vector<16x256xf32> -> vector<16x256xf32>
    %c0_3 = arith.constant 0 : index
    %c0_4 = arith.constant 0 : index
    %3 = vector.load %arg3[%c0_3, %c0_4] : memref<16x256xf32, #tpu.memory_space<vmem>>, vector<16x256xf32>
    tpu.vector_store %arg3[%c0_3, %c0_4], %2 {strides = array<i32>} : memref<16x256xf32, #tpu.memory_space<vmem>>, vector<16x256xf32>,
    return
  }
  func.func @transform_0(%arg0: i32) -> (i32, i32) {
    %c0_i32 = arith.constant 0 : i32
    %c0_i32_0 = arith.constant 0 : i32
    return %arg0, %c0_i32 : i32, i32
  }
  func.func @transform_1(%arg0: i32) -> (i32, i32) {
    %c0_i32 = arith.constant 0 : i32
    %c0_i32_0 = arith.constant 0 : i32
    %c0_i32_1 = arith.constant 0 : i32
    return %c0_i32, %c0_i32_0 : i32, i32
  }
  func.func @transform_2(%arg0: i32) -> (i32, i32) {
    %c0_i32 = arith.constant 0 : i32
    %c0_i32_0 = arith.constant 0 : i32
    return %arg0, %c0_i32 : i32, i32
  }
}

module attributes {stable_mosaic.version = 11 : i64} {
  func.func @_bn_relu_fused_kernel(%arg0: i32, %arg1: memref<16x128xf32, #tpu.memory_space<vmem>>, %arg2: memref<1x128xf32, #tpu.memory_space<vmem>>, %arg3: memref<1x128xf32, #tpu.memory_space<vmem>>, %arg4: memref<16x128xbf16, #tpu.memory_space<vmem>>) attributes {dimension_semantics = [#tpu.dimension_semantics<arbitrary>], iteration_bounds = array<i64: 1>, scalar_prefetch = 0 : i64, scratch_operands = 0 : i64, tpu.core_type = #tpu.core_type<tc>, window_params = [{pipeline_mode = #tpu.pipeline_mode<synchronous>, transform_indices = @transform_0, window_bounds = array<i64: 16, 128>}, {pipeline_mode = #tpu.pipeline_mode<synchronous>, transform_indices = @transform_1, window_bounds = array<i64: 1, 128>}, {pipeline_mode = #tpu.pipeline_mode<synchronous>, transform_indices = @transform_2, window_bounds = array<i64: 1, 128>}, {pipeline_mode = #tpu.pipeline_mode<synchronous>, transform_indices = @transform_3, window_bounds = array<i64: 16, 128>}]} {
    %c0 = arith.constant 0 : index
    %c0_0 = arith.constant 0 : index
    %0 = vector.load %arg1[%c0, %c0_0] : memref<16x128xf32, #tpu.memory_space<vmem>>, vector<16x128xf32>
    %cst = arith.constant dense<0.000000e+00> : vector<128xf32>
    %1 = vector.multi_reduction <add>, %0, %cst [0] : vector<16x128xf32> to vector<128xf32>
    %2 = vector.shape_cast %1 : vector<128xf32> to vector<1x128xf32>
    %cst_1 = arith.constant 1.250000e-01 : f32
    %3 = vector.broadcast %cst_1 : f32 to vector<1x128xf32>
    %4 = arith.mulf %2, %3 : vector<1x128xf32>
    %5 = vector.broadcast %4 : vector<1x128xf32> to vector<16x128xf32>
    %6 = arith.subf %0, %5 : vector<16x128xf32>
    %7 = arith.mulf %6, %6 : vector<16x128xf32>
    %cst_2 = arith.constant dense<0.000000e+00> : vector<128xf32>
    %8 = vector.multi_reduction <add>, %7, %cst_2 [0] : vector<16x128xf32> to vector<128xf32>
    %9 = vector.shape_cast %8 : vector<128xf32> to vector<1x128xf32>
    %cst_3 = arith.constant 8.000000e+00 : f32
    %10 = vector.broadcast %cst_3 : f32 to vector<1x128xf32>
    %11 = arith.mulf %10, %4 : vector<1x128xf32>
    %12 = arith.mulf %11, %4 : vector<1x128xf32>
    %13 = arith.subf %9, %12 : vector<1x128xf32>
    %cst_4 = arith.constant 1.250000e-01 : f32
    %14 = vector.broadcast %cst_4 : f32 to vector<1x128xf32>
    %15 = arith.mulf %13, %14 : vector<1x128xf32>
    %cst_5 = arith.constant 9.99999974E-6 : f32
    %16 = vector.broadcast %cst_5 : f32 to vector<1x128xf32>
    %17 = arith.addf %15, %16 : vector<1x128xf32>
    %18 = math.rsqrt %17 : vector<1x128xf32>
    %c0_6 = arith.constant 0 : index
    %c0_7 = arith.constant 0 : index
    %19 = vector.load %arg2[%c0_6, %c0_7] : memref<1x128xf32, #tpu.memory_space<vmem>>, vector<1x128xf32>
    %20 = arith.mulf %19, %18 : vector<1x128xf32>
    %c0_8 = arith.constant 0 : index
    %c0_9 = arith.constant 0 : index
    %21 = vector.load %arg3[%c0_8, %c0_9] : memref<1x128xf32, #tpu.memory_space<vmem>>, vector<1x128xf32>
    %22 = arith.mulf %4, %20 : vector<1x128xf32>
    %23 = arith.subf %21, %22 : vector<1x128xf32>
    %24 = vector.broadcast %20 : vector<1x128xf32> to vector<16x128xf32>
    %25 = arith.mulf %0, %24 : vector<16x128xf32>
    %26 = vector.broadcast %23 : vector<1x128xf32> to vector<16x128xf32>
    %27 = arith.addf %25, %26 : vector<16x128xf32>
    %cst_10 = arith.constant 0.000000e+00 : f32
    %28 = vector.broadcast %cst_10 : f32 to vector<16x128xf32>
    %29 = arith.maximumf %27, %28 : vector<16x128xf32>
    %30 = arith.truncf %29 : vector<16x128xf32> to vector<16x128xbf16>
    %c0_11 = arith.constant 0 : index
    %c0_12 = arith.constant 0 : index
    %31 = vector.load %arg4[%c0_11, %c0_12] : memref<16x128xbf16, #tpu.memory_space<vmem>>, vector<16x128xbf16>
    tpu.vector_store %arg4[%c0_11, %c0_12], %30 {strides = array<i32>} : memref<16x128xbf16, #tpu.memory_space<vmem>>, vector<16x128xbf16>,
    return
  }
  func.func @transform_0(%arg0: i32) -> (i32, i32) {
    %c0_i32 = arith.constant 0 : i32
    %c0_i32_0 = arith.constant 0 : i32
    %c0_i32_1 = arith.constant 0 : i32
    return %c0_i32, %c0_i32_0 : i32, i32
  }
  func.func @transform_1(%arg0: i32) -> (i32, i32) {
    %c0_i32 = arith.constant 0 : i32
    %c0_i32_0 = arith.constant 0 : i32
    %c0_i32_1 = arith.constant 0 : i32
    return %c0_i32, %c0_i32_0 : i32, i32
  }
  func.func @transform_2(%arg0: i32) -> (i32, i32) {
    %c0_i32 = arith.constant 0 : i32
    %c0_i32_0 = arith.constant 0 : i32
    %c0_i32_1 = arith.constant 0 : i32
    return %c0_i32, %c0_i32_0 : i32, i32
  }
  func.func @transform_3(%arg0: i32) -> (i32, i32) {
    %c0_i32 = arith.constant 0 : i32
    %c0_i32_0 = arith.constant 0 : i32
    %c0_i32_1 = arith.constant 0 : i32
    return %c0_i32, %c0_i32_0 : i32, i32
  }
}

module attributes {stable_mosaic.version = 11 : i64} {
  func.func @_bn_relu_fused_kernel(%arg0: i32, %arg1: memref<32x128xf32, #tpu.memory_space<vmem>>, %arg2: memref<1x128xf32, #tpu.memory_space<vmem>>, %arg3: memref<1x128xf32, #tpu.memory_space<vmem>>, %arg4: memref<32x128xbf16, #tpu.memory_space<vmem>>) attributes {dimension_semantics = [#tpu.dimension_semantics<arbitrary>], iteration_bounds = array<i64: 1>, scalar_prefetch = 0 : i64, scratch_operands = 0 : i64, tpu.core_type = #tpu.core_type<tc>, window_params = [{pipeline_mode = #tpu.pipeline_mode<synchronous>, transform_indices = @transform_0, window_bounds = array<i64: 32, 128>}, {pipeline_mode = #tpu.pipeline_mode<synchronous>, transform_indices = @transform_1, window_bounds = array<i64: 1, 128>}, {pipeline_mode = #tpu.pipeline_mode<synchronous>, transform_indices = @transform_2, window_bounds = array<i64: 1, 128>}, {pipeline_mode = #tpu.pipeline_mode<synchronous>, transform_indices = @transform_3, window_bounds = array<i64: 32, 128>}]} {
    %c0 = arith.constant 0 : index
    %c0_0 = arith.constant 0 : index
    %0 = vector.load %arg1[%c0, %c0_0] : memref<32x128xf32, #tpu.memory_space<vmem>>, vector<32x128xf32>
    %cst = arith.constant dense<0.000000e+00> : vector<128xf32>
    %1 = vector.multi_reduction <add>, %0, %cst [0] : vector<32x128xf32> to vector<128xf32>
    %2 = vector.shape_cast %1 : vector<128xf32> to vector<1x128xf32>
    %cst_1 = arith.constant 3.125000e-02 : f32
    %3 = vector.broadcast %cst_1 : f32 to vector<1x128xf32>
    %4 = arith.mulf %2, %3 : vector<1x128xf32>
    %5 = vector.broadcast %4 : vector<1x128xf32> to vector<32x128xf32>
    %6 = arith.subf %0, %5 : vector<32x128xf32>
    %7 = arith.mulf %6, %6 : vector<32x128xf32>
    %cst_2 = arith.constant dense<0.000000e+00> : vector<128xf32>
    %8 = vector.multi_reduction <add>, %7, %cst_2 [0] : vector<32x128xf32> to vector<128xf32>
    %9 = vector.shape_cast %8 : vector<128xf32> to vector<1x128xf32>
    %cst_3 = arith.constant 0.000000e+00 : f32
    %10 = vector.broadcast %cst_3 : f32 to vector<1x128xf32>
    %11 = arith.mulf %10, %4 : vector<1x128xf32>
    %12 = arith.mulf %11, %4 : vector<1x128xf32>
    %13 = arith.subf %9, %12 : vector<1x128xf32>
    %cst_4 = arith.constant 3.125000e-02 : f32
    %14 = vector.broadcast %cst_4 : f32 to vector<1x128xf32>
    %15 = arith.mulf %13, %14 : vector<1x128xf32>
    %cst_5 = arith.constant 9.99999974E-6 : f32
    %16 = vector.broadcast %cst_5 : f32 to vector<1x128xf32>
    %17 = arith.addf %15, %16 : vector<1x128xf32>
    %18 = math.rsqrt %17 : vector<1x128xf32>
    %c0_6 = arith.constant 0 : index
    %c0_7 = arith.constant 0 : index
    %19 = vector.load %arg2[%c0_6, %c0_7] : memref<1x128xf32, #tpu.memory_space<vmem>>, vector<1x128xf32>
    %20 = arith.mulf %19, %18 : vector<1x128xf32>
    %c0_8 = arith.constant 0 : index
    %c0_9 = arith.constant 0 : index
    %21 = vector.load %arg3[%c0_8, %c0_9] : memref<1x128xf32, #tpu.memory_space<vmem>>, vector<1x128xf32>
    %22 = arith.mulf %4, %20 : vector<1x128xf32>
    %23 = arith.subf %21, %22 : vector<1x128xf32>
    %24 = vector.broadcast %20 : vector<1x128xf32> to vector<32x128xf32>
    %25 = arith.mulf %0, %24 : vector<32x128xf32>
    %26 = vector.broadcast %23 : vector<1x128xf32> to vector<32x128xf32>
    %27 = arith.addf %25, %26 : vector<32x128xf32>
    %cst_10 = arith.constant 0.000000e+00 : f32
    %28 = vector.broadcast %cst_10 : f32 to vector<32x128xf32>
    %29 = arith.maximumf %27, %28 : vector<32x128xf32>
    %30 = arith.truncf %29 : vector<32x128xf32> to vector<32x128xbf16>
    %c0_11 = arith.constant 0 : index
    %c0_12 = arith.constant 0 : index
    %31 = vector.load %arg4[%c0_11, %c0_12] : memref<32x128xbf16, #tpu.memory_space<vmem>>, vector<32x128xbf16>
    tpu.vector_store %arg4[%c0_11, %c0_12], %30 {strides = array<i32>} : memref<32x128xbf16, #tpu.memory_space<vmem>>, vector<32x128xbf16>,
    return
  }
  func.func @transform_0(%arg0: i32) -> (i32, i32) {
    %c0_i32 = arith.constant 0 : i32
    %c0_i32_0 = arith.constant 0 : i32
    %c0_i32_1 = arith.constant 0 : i32
    return %c0_i32, %c0_i32_0 : i32, i32
  }
  func.func @transform_1(%arg0: i32) -> (i32, i32) {
    %c0_i32 = arith.constant 0 : i32
    %c0_i32_0 = arith.constant 0 : i32
    %c0_i32_1 = arith.constant 0 : i32
    return %c0_i32, %c0_i32_0 : i32, i32
  }
  func.func @transform_2(%arg0: i32) -> (i32, i32) {
    %c0_i32 = arith.constant 0 : i32
    %c0_i32_0 = arith.constant 0 : i32
    %c0_i32_1 = arith.constant 0 : i32
    return %c0_i32, %c0_i32_0 : i32, i32
  }
  func.func @transform_3(%arg0: i32) -> (i32, i32) {
    %c0_i32 = arith.constant 0 : i32
    %c0_i32_0 = arith.constant 0 : i32
    %c0_i32_1 = arith.constant 0 : i32
    return %c0_i32, %c0_i32_0 : i32, i32
  }
}

module attributes {stable_mosaic.version = 11 : i64} {
  func.func @_matmul_kernel(%arg0: i32, %arg1: memref<32x128xbf16, #tpu.memory_space<vmem>>, %arg2: memref<128x128xbf16, #tpu.memory_space<vmem>>, %arg3: memref<32x128xf32, #tpu.memory_space<vmem>>) attributes {dimension_semantics = [#tpu.dimension_semantics<parallel>], iteration_bounds = array<i64: 1>, scalar_prefetch = 0 : i64, scratch_operands = 0 : i64, tpu.core_type = #tpu.core_type<tc>, window_params = [{transform_indices = @transform_0, window_bounds = array<i64: 32, 128>}, {pipeline_mode = #tpu.pipeline_mode<synchronous>, transform_indices = @transform_1, window_bounds = array<i64: 128, 128>}, {transform_indices = @transform_2, window_bounds = array<i64: 32, 128>}]} {
    %c0 = arith.constant 0 : index
    %c0_0 = arith.constant 0 : index
    %0 = vector.load %arg1[%c0, %c0_0] : memref<32x128xbf16, #tpu.memory_space<vmem>>, vector<32x128xbf16>
    %c0_1 = arith.constant 0 : index
    %c0_2 = arith.constant 0 : index
    %1 = vector.load %arg2[%c0_1, %c0_2] : memref<128x128xbf16, #tpu.memory_space<vmem>>, vector<128x128xbf16>
    %cst = arith.constant dense<0.000000e+00> : vector<32x128xf32>
    %2 = tpu.matmul %0, %1, %cst {dimension_numbers = #tpu.dot_dimension_numbers<[1], [0], [0], [1], [0, 0, 1, 1], [], []>} : vector<32x128xbf16>, vector<128x128xbf16>, vector<32x128xf32> -> vector<32x128xf32>
    %c0_3 = arith.constant 0 : index
    %c0_4 = arith.constant 0 : index
    %3 = vector.load %arg3[%c0_3, %c0_4] : memref<32x128xf32, #tpu.memory_space<vmem>>, vector<32x128xf32>
    tpu.vector_store %arg3[%c0_3, %c0_4], %2 {strides = array<i32>} : memref<32x128xf32, #tpu.memory_space<vmem>>, vector<32x128xf32>,
    return
  }
  func.func @transform_0(%arg0: i32) -> (i32, i32) {
    %c0_i32 = arith.constant 0 : i32
    %c0_i32_0 = arith.constant 0 : i32
    return %arg0, %c0_i32 : i32, i32
  }
  func.func @transform_1(%arg0: i32) -> (i32, i32) {
    %c0_i32 = arith.constant 0 : i32
    %c0_i32_0 = arith.constant 0 : i32
    %c0_i32_1 = arith.constant 0 : i32
    return %c0_i32, %c0_i32_0 : i32, i32
  }
  func.func @transform_2(%arg0: i32) -> (i32, i32) {
    %c0_i32 = arith.constant 0 : i32
    %c0_i32_0 = arith.constant 0 : i32
    return %arg0, %c0_i32 : i32, i32
  }
}

module attributes {stable_mosaic.version = 11 : i64} {
  func.func @_matmul_kernel(%arg0: i32, %arg1: memref<128x128xbf16, #tpu.memory_space<vmem>>, %arg2: memref<128x128xbf16, #tpu.memory_space<vmem>>, %arg3: memref<128x128xf32, #tpu.memory_space<vmem>>) attributes {dimension_semantics = [#tpu.dimension_semantics<parallel>], iteration_bounds = array<i64: 1>, scalar_prefetch = 0 : i64, scratch_operands = 0 : i64, tpu.core_type = #tpu.core_type<tc>, window_params = [{transform_indices = @transform_0, window_bounds = array<i64: 128, 128>}, {pipeline_mode = #tpu.pipeline_mode<synchronous>, transform_indices = @transform_1, window_bounds = array<i64: 128, 128>}, {transform_indices = @transform_2, window_bounds = array<i64: 128, 128>}]} {
    %c0 = arith.constant 0 : index
    %c0_0 = arith.constant 0 : index
    %0 = vector.load %arg1[%c0, %c0_0] : memref<128x128xbf16, #tpu.memory_space<vmem>>, vector<128x128xbf16>
    %c0_1 = arith.constant 0 : index
    %c0_2 = arith.constant 0 : index
    %1 = vector.load %arg2[%c0_1, %c0_2] : memref<128x128xbf16, #tpu.memory_space<vmem>>, vector<128x128xbf16>
    %cst = arith.constant dense<0.000000e+00> : vector<128x128xf32>
    %2 = tpu.matmul %0, %1, %cst {dimension_numbers = #tpu.dot_dimension_numbers<[1], [0], [0], [1], [0, 0, 1, 1], [], []>} : vector<128x128xbf16>, vector<128x128xbf16>, vector<128x128xf32> -> vector<128x128xf32>
    %c0_3 = arith.constant 0 : index
    %c0_4 = arith.constant 0 : index
    %3 = vector.load %arg3[%c0_3, %c0_4] : memref<128x128xf32, #tpu.memory_space<vmem>>, vector<128x128xf32>
    tpu.vector_store %arg3[%c0_3, %c0_4], %2 {strides = array<i32>} : memref<128x128xf32, #tpu.memory_space<vmem>>, vector<128x128xf32>,
    return
  }
  func.func @transform_0(%arg0: i32) -> (i32, i32) {
    %c0_i32 = arith.constant 0 : i32
    %c0_i32_0 = arith.constant 0 : i32
    return %arg0, %c0_i32 : i32, i32
  }
  func.func @transform_1(%arg0: i32) -> (i32, i32) {
    %c0_i32 = arith.constant 0 : i32
    %c0_i32_0 = arith.constant 0 : i32
    %c0_i32_1 = arith.constant 0 : i32
    return %c0_i32, %c0_i32_0 : i32, i32
  }
  func.func @transform_2(%arg0: i32) -> (i32, i32) {
    %c0_i32 = arith.constant 0 : i32
    %c0_i32_0 = arith.constant 0 : i32
    return %arg0, %c0_i32 : i32, i32
  }
}

module attributes {stable_mosaic.version = 11 : i64} {
  func.func @_bn_relu_fused_kernel(%arg0: i32, %arg1: memref<128x128xf32, #tpu.memory_space<vmem>>, %arg2: memref<1x128xf32, #tpu.memory_space<vmem>>, %arg3: memref<1x128xf32, #tpu.memory_space<vmem>>, %arg4: memref<128x128xbf16, #tpu.memory_space<vmem>>) attributes {dimension_semantics = [#tpu.dimension_semantics<arbitrary>], iteration_bounds = array<i64: 1>, scalar_prefetch = 0 : i64, scratch_operands = 0 : i64, tpu.core_type = #tpu.core_type<tc>, window_params = [{pipeline_mode = #tpu.pipeline_mode<synchronous>, transform_indices = @transform_0, window_bounds = array<i64: 128, 128>}, {pipeline_mode = #tpu.pipeline_mode<synchronous>, transform_indices = @transform_1, window_bounds = array<i64: 1, 128>}, {pipeline_mode = #tpu.pipeline_mode<synchronous>, transform_indices = @transform_2, window_bounds = array<i64: 1, 128>}, {pipeline_mode = #tpu.pipeline_mode<synchronous>, transform_indices = @transform_3, window_bounds = array<i64: 128, 128>}]} {
    %c0 = arith.constant 0 : index
    %c0_0 = arith.constant 0 : index
    %0 = vector.load %arg1[%c0, %c0_0] : memref<128x128xf32, #tpu.memory_space<vmem>>, vector<128x128xf32>
    %cst = arith.constant dense<0.000000e+00> : vector<128xf32>
    %1 = vector.multi_reduction <add>, %0, %cst [0] : vector<128x128xf32> to vector<128xf32>
    %2 = vector.shape_cast %1 : vector<128xf32> to vector<1x128xf32>
    %cst_1 = arith.constant 7.812500e-03 : f32
    %3 = vector.broadcast %cst_1 : f32 to vector<1x128xf32>
    %4 = arith.mulf %2, %3 : vector<1x128xf32>
    %5 = vector.broadcast %4 : vector<1x128xf32> to vector<128x128xf32>
    %6 = arith.subf %0, %5 : vector<128x128xf32>
    %7 = arith.mulf %6, %6 : vector<128x128xf32>
    %cst_2 = arith.constant dense<0.000000e+00> : vector<128xf32>
    %8 = vector.multi_reduction <add>, %7, %cst_2 [0] : vector<128x128xf32> to vector<128xf32>
    %9 = vector.shape_cast %8 : vector<128xf32> to vector<1x128xf32>
    %cst_3 = arith.constant 0.000000e+00 : f32
    %10 = vector.broadcast %cst_3 : f32 to vector<1x128xf32>
    %11 = arith.mulf %10, %4 : vector<1x128xf32>
    %12 = arith.mulf %11, %4 : vector<1x128xf32>
    %13 = arith.subf %9, %12 : vector<1x128xf32>
    %cst_4 = arith.constant 7.812500e-03 : f32
    %14 = vector.broadcast %cst_4 : f32 to vector<1x128xf32>
    %15 = arith.mulf %13, %14 : vector<1x128xf32>
    %cst_5 = arith.constant 9.99999974E-6 : f32
    %16 = vector.broadcast %cst_5 : f32 to vector<1x128xf32>
    %17 = arith.addf %15, %16 : vector<1x128xf32>
    %18 = math.rsqrt %17 : vector<1x128xf32>
    %c0_6 = arith.constant 0 : index
    %c0_7 = arith.constant 0 : index
    %19 = vector.load %arg2[%c0_6, %c0_7] : memref<1x128xf32, #tpu.memory_space<vmem>>, vector<1x128xf32>
    %20 = arith.mulf %19, %18 : vector<1x128xf32>
    %c0_8 = arith.constant 0 : index
    %c0_9 = arith.constant 0 : index
    %21 = vector.load %arg3[%c0_8, %c0_9] : memref<1x128xf32, #tpu.memory_space<vmem>>, vector<1x128xf32>
    %22 = arith.mulf %4, %20 : vector<1x128xf32>
    %23 = arith.subf %21, %22 : vector<1x128xf32>
    %24 = vector.broadcast %20 : vector<1x128xf32> to vector<128x128xf32>
    %25 = arith.mulf %0, %24 : vector<128x128xf32>
    %26 = vector.broadcast %23 : vector<1x128xf32> to vector<128x128xf32>
    %27 = arith.addf %25, %26 : vector<128x128xf32>
    %cst_10 = arith.constant 0.000000e+00 : f32
    %28 = vector.broadcast %cst_10 : f32 to vector<128x128xf32>
    %29 = arith.maximumf %27, %28 : vector<128x128xf32>
    %30 = arith.truncf %29 : vector<128x128xf32> to vector<128x128xbf16>
    %c0_11 = arith.constant 0 : index
    %c0_12 = arith.constant 0 : index
    %31 = vector.load %arg4[%c0_11, %c0_12] : memref<128x128xbf16, #tpu.memory_space<vmem>>, vector<128x128xbf16>
    tpu.vector_store %arg4[%c0_11, %c0_12], %30 {strides = array<i32>} : memref<128x128xbf16, #tpu.memory_space<vmem>>, vector<128x128xbf16>,
    return
  }
  func.func @transform_0(%arg0: i32) -> (i32, i32) {
    %c0_i32 = arith.constant 0 : i32
    %c0_i32_0 = arith.constant 0 : i32
    %c0_i32_1 = arith.constant 0 : i32
    return %c0_i32, %c0_i32_0 : i32, i32
  }
  func.func @transform_1(%arg0: i32) -> (i32, i32) {
    %c0_i32 = arith.constant 0 : i32
    %c0_i32_0 = arith.constant 0 : i32
    %c0_i32_1 = arith.constant 0 : i32
    return %c0_i32, %c0_i32_0 : i32, i32
  }
  func.func @transform_2(%arg0: i32) -> (i32, i32) {
    %c0_i32 = arith.constant 0 : i32
    %c0_i32_0 = arith.constant 0 : i32
    %c0_i32_1 = arith.constant 0 : i32
    return %c0_i32, %c0_i32_0 : i32, i32
  }
  func.func @transform_3(%arg0: i32) -> (i32, i32) {
    %c0_i32 = arith.constant 0 : i32
    %c0_i32_0 = arith.constant 0 : i32
    %c0_i32_1 = arith.constant 0 : i32
    return %c0_i32, %c0_i32_0 : i32, i32
  }
}

module attributes {stable_mosaic.version = 11 : i64} {
  func.func @_bn_relu_fused_kernel(%arg0: i32, %arg1: memref<512x128xf32, #tpu.memory_space<vmem>>, %arg2: memref<1x128xf32, #tpu.memory_space<vmem>>, %arg3: memref<1x128xf32, #tpu.memory_space<vmem>>, %arg4: memref<512x128xbf16, #tpu.memory_space<vmem>>) attributes {dimension_semantics = [#tpu.dimension_semantics<arbitrary>], iteration_bounds = array<i64: 1>, scalar_prefetch = 0 : i64, scratch_operands = 0 : i64, tpu.core_type = #tpu.core_type<tc>, window_params = [{pipeline_mode = #tpu.pipeline_mode<synchronous>, transform_indices = @transform_0, window_bounds = array<i64: 512, 128>}, {pipeline_mode = #tpu.pipeline_mode<synchronous>, transform_indices = @transform_1, window_bounds = array<i64: 1, 128>}, {pipeline_mode = #tpu.pipeline_mode<synchronous>, transform_indices = @transform_2, window_bounds = array<i64: 1, 128>}, {pipeline_mode = #tpu.pipeline_mode<synchronous>, transform_indices = @transform_3, window_bounds = array<i64: 512, 128>}]} {
    %c0 = arith.constant 0 : index
    %c0_0 = arith.constant 0 : index
    %0 = vector.load %arg1[%c0, %c0_0] : memref<512x128xf32, #tpu.memory_space<vmem>>, vector<512x128xf32>
    %cst = arith.constant dense<0.000000e+00> : vector<128xf32>
    %1 = vector.multi_reduction <add>, %0, %cst [0] : vector<512x128xf32> to vector<128xf32>
    %2 = vector.shape_cast %1 : vector<128xf32> to vector<1x128xf32>
    %cst_1 = arith.constant 0.001953125 : f32
    %3 = vector.broadcast %cst_1 : f32 to vector<1x128xf32>
    %4 = arith.mulf %2, %3 : vector<1x128xf32>
    %5 = vector.broadcast %4 : vector<1x128xf32> to vector<512x128xf32>
    %6 = arith.subf %0, %5 : vector<512x128xf32>
    %7 = arith.mulf %6, %6 : vector<512x128xf32>
    %cst_2 = arith.constant dense<0.000000e+00> : vector<128xf32>
    %8 = vector.multi_reduction <add>, %7, %cst_2 [0] : vector<512x128xf32> to vector<128xf32>
    %9 = vector.shape_cast %8 : vector<128xf32> to vector<1x128xf32>
    %cst_3 = arith.constant 0.000000e+00 : f32
    %10 = vector.broadcast %cst_3 : f32 to vector<1x128xf32>
    %11 = arith.mulf %10, %4 : vector<1x128xf32>
    %12 = arith.mulf %11, %4 : vector<1x128xf32>
    %13 = arith.subf %9, %12 : vector<1x128xf32>
    %cst_4 = arith.constant 0.001953125 : f32
    %14 = vector.broadcast %cst_4 : f32 to vector<1x128xf32>
    %15 = arith.mulf %13, %14 : vector<1x128xf32>
    %cst_5 = arith.constant 9.99999974E-6 : f32
    %16 = vector.broadcast %cst_5 : f32 to vector<1x128xf32>
    %17 = arith.addf %15, %16 : vector<1x128xf32>
    %18 = math.rsqrt %17 : vector<1x128xf32>
    %c0_6 = arith.constant 0 : index
    %c0_7 = arith.constant 0 : index
    %19 = vector.load %arg2[%c0_6, %c0_7] : memref<1x128xf32, #tpu.memory_space<vmem>>, vector<1x128xf32>
    %20 = arith.mulf %19, %18 : vector<1x128xf32>
    %c0_8 = arith.constant 0 : index
    %c0_9 = arith.constant 0 : index
    %21 = vector.load %arg3[%c0_8, %c0_9] : memref<1x128xf32, #tpu.memory_space<vmem>>, vector<1x128xf32>
    %22 = arith.mulf %4, %20 : vector<1x128xf32>
    %23 = arith.subf %21, %22 : vector<1x128xf32>
    %24 = vector.broadcast %20 : vector<1x128xf32> to vector<512x128xf32>
    %25 = arith.mulf %0, %24 : vector<512x128xf32>
    %26 = vector.broadcast %23 : vector<1x128xf32> to vector<512x128xf32>
    %27 = arith.addf %25, %26 : vector<512x128xf32>
    %cst_10 = arith.constant 0.000000e+00 : f32
    %28 = vector.broadcast %cst_10 : f32 to vector<512x128xf32>
    %29 = arith.maximumf %27, %28 : vector<512x128xf32>
    %30 = arith.truncf %29 : vector<512x128xf32> to vector<512x128xbf16>
    %c0_11 = arith.constant 0 : index
    %c0_12 = arith.constant 0 : index
    %31 = vector.load %arg4[%c0_11, %c0_12] : memref<512x128xbf16, #tpu.memory_space<vmem>>, vector<512x128xbf16>
    tpu.vector_store %arg4[%c0_11, %c0_12], %30 {strides = array<i32>} : memref<512x128xbf16, #tpu.memory_space<vmem>>, vector<512x128xbf16>,
    return
  }
  func.func @transform_0(%arg0: i32) -> (i32, i32) {
    %c0_i32 = arith.constant 0 : i32
    %c0_i32_0 = arith.constant 0 : i32
    %c0_i32_1 = arith.constant 0 : i32
    return %c0_i32, %c0_i32_0 : i32, i32
  }
  func.func @transform_1(%arg0: i32) -> (i32, i32) {
    %c0_i32 = arith.constant 0 : i32
    %c0_i32_0 = arith.constant 0 : i32
    %c0_i32_1 = arith.constant 0 : i32
    return %c0_i32, %c0_i32_0 : i32, i32
  }
  func.func @transform_2(%arg0: i32) -> (i32, i32) {
    %c0_i32 = arith.constant 0 : i32
    %c0_i32_0 = arith.constant 0 : i32
    %c0_i32_1 = arith.constant 0 : i32
    return %c0_i32, %c0_i32_0 : i32, i32
  }
  func.func @transform_3(%arg0: i32) -> (i32, i32) {
    %c0_i32 = arith.constant 0 : i32
    %c0_i32_0 = arith.constant 0 : i32
    %c0_i32_1 = arith.constant 0 : i32
    return %c0_i32, %c0_i32_0 : i32, i32
  }
}

module attributes {stable_mosaic.version = 11 : i64} {
  func.func @_matmul_kernel(%arg0: i32, %arg1: memref<256x128xbf16, #tpu.memory_space<vmem>>, %arg2: memref<128x128xbf16, #tpu.memory_space<vmem>>, %arg3: memref<256x128xf32, #tpu.memory_space<vmem>>) attributes {dimension_semantics = [#tpu.dimension_semantics<parallel>], iteration_bounds = array<i64: 2>, scalar_prefetch = 0 : i64, scratch_operands = 0 : i64, tpu.core_type = #tpu.core_type<tc>, window_params = [{transform_indices = @transform_0, window_bounds = array<i64: 256, 128>}, {pipeline_mode = #tpu.pipeline_mode<synchronous>, transform_indices = @transform_1, window_bounds = array<i64: 128, 128>}, {transform_indices = @transform_2, window_bounds = array<i64: 256, 128>}]} {
    %c0 = arith.constant 0 : index
    %c0_0 = arith.constant 0 : index
    %0 = vector.load %arg1[%c0, %c0_0] : memref<256x128xbf16, #tpu.memory_space<vmem>>, vector<256x128xbf16>
    %c0_1 = arith.constant 0 : index
    %c0_2 = arith.constant 0 : index
    %1 = vector.load %arg2[%c0_1, %c0_2] : memref<128x128xbf16, #tpu.memory_space<vmem>>, vector<128x128xbf16>
    %cst = arith.constant dense<0.000000e+00> : vector<256x128xf32>
    %2 = tpu.matmul %0, %1, %cst {dimension_numbers = #tpu.dot_dimension_numbers<[1], [0], [0], [1], [0, 0, 1, 1], [], []>} : vector<256x128xbf16>, vector<128x128xbf16>, vector<256x128xf32> -> vector<256x128xf32>
    %c0_3 = arith.constant 0 : index
    %c0_4 = arith.constant 0 : index
    %3 = vector.load %arg3[%c0_3, %c0_4] : memref<256x128xf32, #tpu.memory_space<vmem>>, vector<256x128xf32>
    tpu.vector_store %arg3[%c0_3, %c0_4], %2 {strides = array<i32>} : memref<256x128xf32, #tpu.memory_space<vmem>>, vector<256x128xf32>,
    return
  }
  func.func @transform_0(%arg0: i32) -> (i32, i32) {
    %c0_i32 = arith.constant 0 : i32
    %c0_i32_0 = arith.constant 0 : i32
    return %arg0, %c0_i32 : i32, i32
  }
  func.func @transform_1(%arg0: i32) -> (i32, i32) {
    %c0_i32 = arith.constant 0 : i32
    %c0_i32_0 = arith.constant 0 : i32
    %c0_i32_1 = arith.constant 0 : i32
    return %c0_i32, %c0_i32_0 : i32, i32
  }
  func.func @transform_2(%arg0: i32) -> (i32, i32) {
    %c0_i32 = arith.constant 0 : i32
    %c0_i32_0 = arith.constant 0 : i32
    return %arg0, %c0_i32 : i32, i32
  }
}

module attributes {stable_mosaic.version = 11 : i64} {
  func.func @_tanh_kernel(%arg0: i32, %arg1: memref<48x128xf32, #tpu.memory_space<vmem>>, %arg2: memref<48x128xf32, #tpu.memory_space<vmem>>) attributes {dimension_semantics = [#tpu.dimension_semantics<parallel>], iteration_bounds = array<i64: 1>, scalar_prefetch = 0 : i64, scratch_operands = 0 : i64, tpu.core_type = #tpu.core_type<tc>, window_params = [{transform_indices = @transform_0, window_bounds = array<i64: 48, 128>}, {transform_indices = @transform_1, window_bounds = array<i64: 48, 128>}]} {
    %c0 = arith.constant 0 : index
    %c0_0 = arith.constant 0 : index
    %0 = vector.load %arg1[%c0, %c0_0] : memref<48x128xf32, #tpu.memory_space<vmem>>, vector<48x128xf32>
    %1 = math.tanh %0 : vector<48x128xf32>
    %c0_1 = arith.constant 0 : index
    %c0_2 = arith.constant 0 : index
    %2 = vector.load %arg2[%c0_1, %c0_2] : memref<48x128xf32, #tpu.memory_space<vmem>>, vector<48x128xf32>
    tpu.vector_store %arg2[%c0_1, %c0_2], %1 {strides = array<i32>} : memref<48x128xf32, #tpu.memory_space<vmem>>, vector<48x128xf32>,
    return
  }
  func.func @transform_0(%arg0: i32) -> (i32, i32) {
    %c0_i32 = arith.constant 0 : i32
    %c0_i32_0 = arith.constant 0 : i32
    return %arg0, %c0_i32 : i32, i32
  }
  func.func @transform_1(%arg0: i32) -> (i32, i32) {
    %c0_i32 = arith.constant 0 : i32
    %c0_i32_0 = arith.constant 0 : i32
    return %arg0, %c0_i32 : i32, i32
  }
}

</mosaic_0001>

<bundles_post_ra>
// kernel: gta_g_forward.12
= control target key start
LH: loop header
LB: loop body
LE: loop exit
PB: predicated region body
PF: predicated region fallthrough
CT: control target
= control target key end

     0   :  { %v210_v1 = vmov 0   ;;  %s289_s1 = inlined_call_operand.vmem [shape: bf16[128,256], index: 1, kind: input, shape index: {}]   ;;  %s290_s0 = inlined_call_operand.vmem [shape: bf16[16,128], index: 0, kind: input, shape index: {}]   ;;  %s291_s2 = inlined_call_operand.vmem [shape: f32[16,256], index: 2, kind: output, shape index: {}]  }
   0x1   :  { %v185_v0 = vld [vmem:[%s289_s1 + $0x74] ss:$8 sps:$4 sm:$0xff]   ;;  %148 = vmatprep.mubr.bf16.mxu0 %v210_v1  ;;  %v187_v2 = vld [vmem:[%s289_s1 + $0x70] ss:$8 sps:$4 sm:$0xff]   ;;  %v188_v3 = vld [vmem:[%s289_s1 + $0x64] ss:$8 sps:$4 sm:$0xff]  }
   0x2   :  { %116 = vmatprep.subr.bf16.mxu0 %v185_v0  ;;  %v190_v4 = vld [vmem:[%s289_s1 + $0x60] ss:$8 sps:$4 sm:$0xff]   ;;  %v191_v5 = vld [vmem:[%s289_s1 + $0x54] ss:$8 sps:$4 sm:$0xff]   ;;  %v193_v6 = vld [vmem:[%s289_s1 + $0x50] ss:$8 sps:$4 sm:$0xff]  }
   0x3   :  { %117 = vmatpush1.bf16.msra.mxu0 %v187_v2  ;;  %v194_v7 = vld [vmem:[%s289_s1 + $0x44] ss:$8 sps:$4 sm:$0xff]   ;;  %v196_v8 = vld [vmem:[%s289_s1 + $0x40] ss:$8 sps:$4 sm:$0xff]   ;;  %v197_v9 = vld [vmem:[%s289_s1 + $0x34] ss:$8 sps:$4 sm:$0xff]  }
   0x4   :  { %118 = vmatprep.subr.bf16.mxu0 %v188_v3  ;;  %v199_v10 = vld [vmem:[%s289_s1 + $0x30] ss:$8 sps:$4 sm:$0xff]   ;;  %v200_v11 = vld [vmem:[%s289_s1 + $0x24] ss:$8 sps:$4 sm:$0xff]   ;;  %v202_v12 = vld [vmem:[%s289_s1 + $0x20] ss:$8 sps:$4 sm:$0xff]  }
   0x5   :  { %v203_v13 = vld [vmem:[%s289_s1 + $0x14] ss:$8 sps:$4 sm:$0xff]   ;;  %v205_v14 = vld [vmem:[%s289_s1 + $0x10] ss:$8 sps:$4 sm:$0xff]   ;;  %v206_v15 = vld [vmem:[%s289_s1 + $0x4] ss:$8 sps:$4 sm:$0xff]  }
   0x6   :  { %v208_v16 = vld [vmem:[%s289_s1] ss:$8 sps:$4 sm:$0xff]  }
   0x7   :  { %119 = vmatpush1.bf16.msra.mxu0 %v190_v4  ;;  %v209_v17 = vld [vmem:[%s290_s0] sm:$0xff]  }
   0x8   :  { %120 = vmatprep.subr.bf16.mxu0 %v191_v5 }
   0xb   :  { %121 = vmatpush1.bf16.msra.mxu0 %v193_v6 }
   0xc   :  { %122 = vmatprep.subr.bf16.mxu0 %v194_v7 }
   0xf   :  { %123 = vmatpush1.bf16.msra.mxu0 %v196_v8 }
  0x10   :  { %124 = vmatprep.subr.bf16.mxu0 %v197_v9 }
  0x13   :  { %125 = vmatpush1.bf16.msra.mxu0 %v199_v10 }
  0x14   :  { %126 = vmatprep.subr.bf16.mxu0 %v200_v11 }
  0x17   :  { %127 = vmatpush1.bf16.msra.mxu0 %v202_v12 }
  0x18   :  { %128 = vmatprep.subr.bf16.mxu0 %v203_v13 }
  0x1b   :  { %129 = vmatpush1.bf16.msra.mxu0 %v205_v14 }
  0x1c   :  { %130 = vmatprep.subr.bf16.mxu0 %v206_v15 }
  0x1f   :  { %131 = vmatpush1.bf16.msra.mxu0 %v208_v16 }
  0x22   :  { %149 = vmatmul.mubr.bf16.vlgmr.msra.gmra.mxu0 %v209_v17 }
  0xe2   :  { %v150_v18 = vpop.f32.mrf.mxu0 }
  0xe3   :  { %159 = vst [vmem:[%s291_s2] sm:$0xff] %v150_v18 }
  0xe4   :  { %v152_v19 = vpop.f32.mrf.mxu0 }
  0xe5   :  { %160 = vst [vmem:[%s291_s2 + $0x8] sm:$0xff] %v152_v19 }
  0xe6   :  { %v154_v20 = vpop.f32.mrf.mxu0 }
  0xe7   :  { %161 = vst [vmem:[%s291_s2 + $0x10] sm:$0xff] %v154_v20 }
  0xe8   :  { %v156_v21 = vpop.f32.mrf.mxu0 }
  0xe9   :  { %162 = vst [vmem:[%s291_s2 + $0x18] sm:$0xff] %v156_v21 }

// kernel: gta_g_forward.10
= control target key start
LH: loop header
LB: loop body
LE: loop exit
PB: predicated region body
PF: predicated region fallthrough
CT: control target
= control target key end

     0   :  { %7 = vsyncpa [#allocation3], 0  ;;  %s220_s9 = smov [#allocation2]   ;;  %s252_s0 = inlined_call_operand.vmem [shape: bf16[16,128], index: 0, kind: input, shape index: {}]   ;;  %s253_s1 = inlined_call_operand.hbm [shape: bf16[128,128], index: 1, kind: input, shape index: {}]   ;;  %s254_s2 = inlined_call_operand.vmem [shape: f32[16,128], index: 2, kind: output, shape index: {}]  }
   0x1   :  { %s15_s10 = sshll.u32 %s220_s9, 4  ;;  %s16_s10 = int_to_ptr.vmem [resolvable:$true] %s15_s10 }
   0x2   :  { %s206_s11 = scalar_lea.vmem %s16_s10, 1024  ;;  %p211_p1 = scmp.lt.s32.totalorder %s16_s10, %s16_s10 }
   0x3   :  { %p207_p0 = scmp.ne.s32.totalorder %s16_s10, %s206_s11  ;;  %p212_p2 = scmp.lt.s32.totalorder %s206_s11, %s206_s11 }
   0x5   :  { %p213_p3 = por %p212_p2, %p211_p1 }
   0x7   :  { %p214_p4 = pnand %p213_p3, %p207_p0 }
   0x9   :  { %217 = shalt.err (!%p214_p4)
}
   0xa   :  { %s221_s12 = smov 64   ;;  %s222_s13 = smov 4  }
   0xb   :  { %21 = dma.hbm_to_vmem [thread:$0]  %s253_s1, 1024, %s16_s10, [#allocation3], %s221_s12, %s221_s12, %s222_s13  }
   0xc   :  { %218 = dma.done.wait [#allocation3], 1024  }
   0xd   :  { %219 = vsyncadd [#allocation3], 4294966272  ;;  %v223_v0 = vmov 0.0   ;;  %vm224_vm0 = vmmov 0   ;;  %v189_v1 = vld [vmem:[#allocation2 + $0x38] sm:$0xff]   ;;  %v190_v2 = vld [vmem:[#allocation2 + $0x30] sm:$0xff]  }
   0xe   :  { %164 = vmatprep.subr.bf16.mxu0 %v223_v0  ;;  %180 = vmatprep.mubr.msk.bf16.mxu0 %vm224_vm0, %v223_v0  ;;  %v191_v3 = vld [vmem:[#allocation2 + $0x28] sm:$0xff]   ;;  %v192_v4 = vld [vmem:[#allocation2 + $0x20] sm:$0xff]   ;;  %v193_v5 = vld [vmem:[#allocation2 + $0x18] sm:$0xff]  }
   0xf   :  { %165 = vmatpush3.bf16.msra.mxu0 %v189_v1  ;;  %v194_v6 = vld [vmem:[#allocation2 + $0x10] sm:$0xff]   ;;  %v195_v7 = vld [vmem:[#allocation2 + $0x8] sm:$0xff]   ;;  %v196_v8 = vld [vmem:[#allocation2] sm:$0xff]  }
  0x10   :  { %166 = vmatprep.subr.bf16.mxu0 %v223_v0  ;;  %v197_v9 = vld [vmem:[%s252_s0] sm:$0xff]  }
  0x13   :  { %167 = vmatpush3.bf16.msra.mxu0 %v190_v2 }
  0x14   :  { %168 = vmatprep.subr.bf16.mxu0 %v223_v0 }
  0x17   :  { %169 = vmatpush3.bf16.msra.mxu0 %v191_v3 }
  0x18   :  { %170 = vmatprep.subr.bf16.mxu0 %v223_v0 }
  0x1b   :  { %171 = vmatpush3.bf16.msra.mxu0 %v192_v4 }
  0x1c   :  { %172 = vmatprep.subr.bf16.mxu0 %v223_v0 }
  0x1f   :  { %173 = vmatpush3.bf16.msra.mxu0 %v193_v5 }
  0x20   :  { %174 = vmatprep.subr.bf16.mxu0 %v223_v0 }
  0x23   :  { %175 = vmatpush3.bf16.msra.mxu0 %v194_v6 }
  0x24   :  { %176 = vmatprep.subr.bf16.mxu0 %v223_v0 }
  0x27   :  { %177 = vmatpush3.bf16.msra.mxu0 %v195_v7 }
  0x28   :  { %178 = vmatprep.subr.bf16.mxu0 %v223_v0 }
  0x2b   :  { %179 = vmatpush3.bf16.msra.mxu0 %v196_v8 }
  0x2e   :  { %181 = vmatmul.mubr.bf16.vlgmr.msra.gmra.mxu0 %v197_v9 }
  0xee   :  { %v132_v10 = vpop.f32.mrf.mxu0 }
  0xef   :  { %139 = vst [vmem:[%s254_s2] sm:$0xff] %v132_v10 }
  0xf0   :  { %v182_v11 = vpop.f32.mrf.mxu0 }
  0xf2   :  { %v135_v12 = vpop.f32.mrf.mxu0 }
  0xf3   :  { %140 = vst [vmem:[%s254_s2 + $0x8] sm:$0xff] %v135_v12 }
  0xf4   :  { %v183_v13 = vpop.f32.mrf.mxu0 }
  0xf5   :  { %145 = vsyncpa [#allocation3], 1 }

// kernel: gta_g_forward.11
= control target key start
LH: loop header
LB: loop body
LE: loop exit
PB: predicated region body
PF: predicated region fallthrough
CT: control target
= control target key end

     0   :  { %v47_v26 = vlaneseq  ;;  %s124_s0 = inlined_call_operand.vmem [shape: f32[16,128], index: 0, kind: input, shape index: {}]   ;;  %s125_s1 = inlined_call_operand.vmem [shape: f32[1,128], index: 1, kind: input, shape index: {}]   ;;  %s126_s2 = inlined_call_operand.vmem [shape: f32[1,128], index: 2, kind: input, shape index: {}]   ;;  %s127_s3 = inlined_call_operand.vmem [shape: bf16[16,128], index: 3, kind: output, shape index: {}]  }
   0x1   :  { %v14_v0 = vld [vmem:[%s124_s0] sm:$0xff]  ;;  %v15_v1 = vld [vmem:[%s124_s0 + $0x8] sm:$0xff] }
   0x2   :  { %v16_v2 = vadd.f32 %v15_v1, %v14_v0  ;;  %v48_v27 = vshrl.u32 %v47_v26, 7  ;;  %v41_v28 = vld [vmem:[%s125_s1] sm:$0x1] }
   0x3   :  { %v43_v32 = vld [vmem:[%s126_s2] sm:$0x1] }
   0x4   :  { %v17_v3 = vrot.slane %v16_v2, 4  ;;  %v49_v29 = vsub.s32 0, %v48_v27 }
   0x6   :  { %v18_v4 = vadd.f32 %v17_v3, %v16_v2 }
   0x8   :  { %v19_v5 = vrot.slane %v18_v4, 2 }
   0xa   :  { %v20_v6 = vadd.f32 %v19_v5, %v18_v4 }
   0xc   :  { %v21_v7 = vrot.slane %v20_v6, 1 }
   0xe   :  { %v22_v8 = vadd.f32 %v21_v7, %v20_v6 }
  0x10   :  { %v23_v9 = vmul.f32 0.125, %v22_v8 }
  0x12   :  { %v24_v10 = vsub.f32 %v14_v0, %v23_v9  ;;  %v25_v11 = vsub.f32 %v15_v1, %v23_v9  ;;  %v35_v18 = vmul.f32 8.0, %v23_v9 }
  0x14   :  { %v26_v12 = vmul.f32 %v24_v10, %v24_v10  ;;  %v27_v13 = vmul.f32 %v25_v11, %v25_v11  ;;  %v36_v21 = vmul.f32 %v35_v18, %v23_v9 }
  0x16   :  { %v28_v14 = vadd.f32 %v27_v13, %v26_v12 }
  0x18   :  { %v29_v15 = vrot.slane %v28_v14, 4 }
  0x1a   :  { %v30_v16 = vadd.f32 %v29_v15, %v28_v14 }
  0x1c   :  { %v31_v17 = vrot.slane %v30_v16, 2 }
  0x1e   :  { %v32_v19 = vadd.f32 %v31_v17, %v30_v16 }
  0x20   :  { %v33_v20 = vrot.slane %v32_v19, 1 }
  0x22   :  { %v34_v22 = vadd.f32 %v33_v20, %v32_v19 }
  0x24   :  { %v37_v23 = vsub.f32 %v34_v22, %v36_v21 }
  0x26   :  { %v38_v24 = vmul.f32 0.125, %v37_v23 }
  0x28   :  { %v39_v25 = vadd.f32 1e-05, %v38_v24 }
  0x2a   :  { %87 = vrsqrt.f32 %v39_v25 }
  0x37   :  { %v88_v30 = vpop.eup %87 }
  0x38   :  { %v42_v31 = vmul.f32 %v88_v30, %v41_v28 }
  0x3a   :  { %v44_v33 = vmul.f32 %v42_v31, %v23_v9  ;;  %v50_v34 = vrot.slane %v42_v31, %v49_v29 }
  0x3c   :  { %v45_v35 = vsub.f32 %v43_v32, %v44_v33  ;;  %v52_v36 = vmul.f32 %v50_v34, %v14_v0  ;;  %v53_v37 = vmul.f32 %v50_v34, %v15_v1 }
  0x3e   :  { %v58_v38 = vrot.slane %v45_v35, %v49_v29 }
  0x40   :  { %v60_v39 = vadd.f32 %v58_v38, %v52_v36  ;;  %v61_v40 = vadd.f32 %v58_v38, %v53_v37 }
  0x42   :  { %v62_v41 = vmax.f32 %v60_v39, 0.0  ;;  %v63_v42 = vmax.f32 %v61_v40, 0.0 }
  0x44   :  { %v85_v43 = vpack.c.bf16 %v63_v42, %v62_v41 }
  0x46   :  { %86 = vst [vmem:[%s127_s3] sm:$0xff] %v85_v43  }

// kernel: gta_g_forward.13
= control target key start
LH: loop header
LB: loop body
LE: loop exit
PB: predicated region body
PF: predicated region fallthrough
CT: control target
= control target key end

     0   :  { %v57_v36 = vlaneseq  ;;  %s169_s0 = inlined_call_operand.vmem [shape: f32[32,128], index: 0, kind: input, shape index: {}]   ;;  %s170_s1 = inlined_call_operand.vmem [shape: f32[1,128], index: 1, kind: input, shape index: {}]   ;;  %s171_s2 = inlined_call_operand.vmem [shape: f32[1,128], index: 2, kind: input, shape index: {}]   ;;  %s172_s3 = inlined_call_operand.vmem [shape: bf16[32,128], index: 3, kind: output, shape index: {}]  }
   0x1   :  { %v14_v0 = vld [vmem:[%s169_s0] sm:$0xff]  ;;  %v15_v1 = vld [vmem:[%s169_s0 + $0x8] sm:$0xff]  ;;  %v16_v2 = vld [vmem:[%s169_s0 + $0x10] sm:$0xff] }
   0x2   :  { %v18_v3 = vadd.f32 %v15_v1, %v14_v0  ;;  %v17_v4 = vld [vmem:[%s169_s0 + $0x18] sm:$0xff]  ;;  %v58_v37 = vshrl.u32 %v57_v36, 7  ;;  %v51_v38 = vld [vmem:[%s170_s1] sm:$0x1] }
   0x3   :  { %v53_v42 = vld [vmem:[%s171_s2] sm:$0x1] }
   0x4   :  { %v19_v5 = vadd.f32 %v18_v3, %v16_v2  ;;  %v59_v39 = vsub.s32 0, %v58_v37 }
   0x6   :  { %v20_v6 = vadd.f32 %v19_v5, %v17_v4 }
   0x8   :  { %v21_v7 = vrot.slane %v20_v6, 4 }
   0xa   :  { %v22_v8 = vadd.f32 %v21_v7, %v20_v6 }
   0xc   :  { %v23_v9 = vrot.slane %v22_v8, 2 }
   0xe   :  { %v24_v10 = vadd.f32 %v23_v9, %v22_v8 }
  0x10   :  { %v25_v11 = vrot.slane %v24_v10, 1 }
  0x12   :  { %v26_v12 = vadd.f32 %v25_v11, %v24_v10 }
  0x14   :  { %v27_v13 = vmul.f32 0.03125, %v26_v12 }
  0x16   :  { %v28_v14 = vsub.f32 %v14_v0, %v27_v13  ;;  %v29_v15 = vsub.f32 %v15_v1, %v27_v13  ;;  %v30_v16 = vsub.f32 %v16_v2, %v27_v13  ;;  %v31_v17 = vsub.f32 %v17_v4, %v27_v13 }
  0x17   :  { %v45_v28 = vmul.f32 0.0, %v27_v13 }
  0x18   :  { %v32_v18 = vmul.f32 %v28_v14, %v28_v14  ;;  %v33_v19 = vmul.f32 %v29_v15, %v29_v15  ;;  %v34_v20 = vmul.f32 %v30_v16, %v30_v16  ;;  %v35_v21 = vmul.f32 %v31_v17, %v31_v17 }
  0x19   :  { %v46_v31 = vmul.f32 %v45_v28, %v27_v13 }
  0x1a   :  { %v36_v22 = vadd.f32 %v33_v19, %v32_v18 }
  0x1c   :  { %v37_v23 = vadd.f32 %v36_v22, %v34_v20 }
  0x1e   :  { %v38_v24 = vadd.f32 %v37_v23, %v35_v21 }
  0x20   :  { %v39_v25 = vrot.slane %v38_v24, 4 }
  0x22   :  { %v40_v26 = vadd.f32 %v39_v25, %v38_v24 }
  0x24   :  { %v41_v27 = vrot.slane %v40_v26, 2 }
  0x26   :  { %v42_v29 = vadd.f32 %v41_v27, %v40_v26 }
  0x28   :  { %v43_v30 = vrot.slane %v42_v29, 1 }
  0x2a   :  { %v44_v32 = vadd.f32 %v43_v30, %v42_v29 }
  0x2c   :  { %v47_v33 = vsub.f32 %v44_v32, %v46_v31 }
  0x2e   :  { %v48_v34 = vmul.f32 0.03125, %v47_v33 }
  0x30   :  { %v49_v35 = vadd.f32 1e-05, %v48_v34 }
  0x32   :  { %123 = vrsqrt.f32 %v49_v35 }
  0x3f   :  { %v124_v40 = vpop.eup %123 }
  0x40   :  { %v52_v41 = vmul.f32 %v124_v40, %v51_v38 }
  0x42   :  { %v54_v43 = vmul.f32 %v52_v41, %v27_v13  ;;  %v60_v44 = vrot.slane %v52_v41, %v59_v39 }
  0x44   :  { %v55_v45 = vsub.f32 %v53_v42, %v54_v43  ;;  %v62_v46 = vmul.f32 %v60_v44, %v14_v0  ;;  %v63_v47 = vmul.f32 %v60_v44, %v15_v1  ;;  %v64_v48 = vmul.f32 %v60_v44, %v16_v2 }
  0x45   :  { %v65_v49 = vmul.f32 %v60_v44, %v17_v4 }
  0x46   :  { %v70_v50 = vrot.slane %v55_v45, %v59_v39 }
  0x48   :  { %v72_v51 = vadd.f32 %v70_v50, %v62_v46  ;;  %v73_v52 = vadd.f32 %v70_v50, %v63_v47  ;;  %v74_v53 = vadd.f32 %v70_v50, %v64_v48  ;;  %v75_v54 = vadd.f32 %v70_v50, %v65_v49 }
  0x4a   :  { %v76_v55 = vmax.f32 %v72_v51, 0.0  ;;  %v77_v56 = vmax.f32 %v73_v52, 0.0  ;;  %v78_v57 = vmax.f32 %v74_v53, 0.0  ;;  %v79_v58 = vmax.f32 %v75_v54, 0.0 }
  0x4c   :  { %v115_v59 = vpack.c.bf16 %v77_v56, %v76_v55  ;;  %v120_v60 = vpack.c.bf16 %v79_v58, %v78_v57 }
  0x4e   :  { %116 = vst [vmem:[%s172_s3] sm:$0xff] %v115_v59   ;;  %122 = vst [vmem:[%s172_s3 + $0x8] sm:$0xff] %v120_v60  }

// kernel: gta_g_forward.14
= control target key start
LH: loop header
LB: loop body
LE: loop exit
PB: predicated region body
PF: predicated region fallthrough
CT: control target
= control target key end

     0   :  { %s256_s1 = inlined_call_operand.vmem [shape: bf16[128,128], index: 1, kind: input, shape index: {}]   ;;  %s257_s0 = inlined_call_operand.vmem [shape: bf16[32,128], index: 0, kind: input, shape index: {}]   ;;  %s258_s2 = inlined_call_operand.vmem [shape: f32[32,128], index: 2, kind: output, shape index: {}]  }
   0x1   :  { %v189_v0 = vld [vmem:[%s256_s1 + $0x38] sm:$0xff]   ;;  %v190_v1 = vld [vmem:[%s256_s1 + $0x30] sm:$0xff]   ;;  %v191_v2 = vld [vmem:[%s256_s1 + $0x28] sm:$0xff]  }
   0x2   :  { %169 = vmatprep.subr.bf16.mxu0 %v189_v0  ;;  %v192_v3 = vld [vmem:[%s256_s1 + $0x20] sm:$0xff]   ;;  %v193_v5 = vld [vmem:[%s256_s1 + $0x18] sm:$0xff]   ;;  %v194_v6 = vld [vmem:[%s256_s1 + $0x10] sm:$0xff]  }
   0x3   :  { %170 = vmatpush3.bf16.msra.mxu0 %v189_v0  ;;  %v197_v4 = vld [vmem:[%s257_s0] sm:$0xff]   ;;  %v195_v7 = vld [vmem:[%s256_s1 + $0x8] sm:$0xff]  }
   0x4   :  { %171 = vmatprep.subr.bf16.mxu0 %v190_v1  ;;  %185 = vmatprep.mubr.bf16.mxu0 %v197_v4  ;;  %v196_v8 = vld [vmem:[%s256_s1] sm:$0xff]   ;;  %v198_v9 = vld [vmem:[%s257_s0 + $0x8] sm:$0xff]  }
   0x7   :  { %172 = vmatpush3.bf16.msra.mxu0 %v190_v1 }
   0x8   :  { %173 = vmatprep.subr.bf16.mxu0 %v191_v2 }
   0xb   :  { %174 = vmatpush3.bf16.msra.mxu0 %v191_v2 }
   0xc   :  { %175 = vmatprep.subr.bf16.mxu0 %v192_v3 }
   0xf   :  { %176 = vmatpush3.bf16.msra.mxu0 %v192_v3 }
  0x10   :  { %177 = vmatprep.subr.bf16.mxu0 %v193_v5 }
  0x13   :  { %178 = vmatpush3.bf16.msra.mxu0 %v193_v5 }
  0x14   :  { %179 = vmatprep.subr.bf16.mxu0 %v194_v6 }
  0x17   :  { %180 = vmatpush3.bf16.msra.mxu0 %v194_v6 }
  0x18   :  { %181 = vmatprep.subr.bf16.mxu0 %v195_v7 }
  0x1b   :  { %182 = vmatpush3.bf16.msra.mxu0 %v195_v7 }
  0x1c   :  { %183 = vmatprep.subr.bf16.mxu0 %v196_v8 }
  0x1f   :  { %184 = vmatpush3.bf16.msra.mxu0 %v196_v8 }
  0x22   :  { %186 = vmatmul.mubr.bf16.vlgmr.msra.gmra.mxu0 %v198_v9 }
  0xe2   :  { %v187_v10 = vpop.f32.mrf.mxu0 }
  0xe3   :  { %143 = vst [vmem:[%s258_s2 + $0x10] sm:$0xff] %v187_v10 }
  0xe4   :  { %v126_v11 = vpop.f32.mrf.mxu0 }
  0xe5   :  { %141 = vst [vmem:[%s258_s2] sm:$0xff] %v126_v11 }
  0xe6   :  { %v188_v12 = vpop.f32.mrf.mxu0 }
  0xe7   :  { %144 = vst [vmem:[%s258_s2 + $0x18] sm:$0xff] %v188_v12 }
  0xe8   :  { %v129_v13 = vpop.f32.mrf.mxu0 }
  0xe9   :  { %142 = vst [vmem:[%s258_s2 + $0x8] sm:$0xff] %v129_v13 }

// kernel: gta_g_forward.16
= control target key start
LH: loop header
LB: loop body
LE: loop exit
PB: predicated region body
PF: predicated region fallthrough
CT: control target
= control target key end

     0   :  { %s464_s1 = inlined_call_operand.vmem [shape: bf16[128,128], index: 1, kind: input, shape index: {}]   ;;  %s465_s0 = inlined_call_operand.vmem [shape: bf16[128,128], index: 0, kind: input, shape index: {}]   ;;  %s466_s2 = inlined_call_operand.vmem [shape: f32[128,128], index: 2, kind: output, shape index: {}]  }
   0x1   :  { %v337_v0 = vld [vmem:[%s464_s1 + $0x38] sm:$0xff]   ;;  %v338_v1 = vld [vmem:[%s464_s1 + $0x30] sm:$0xff]   ;;  %v339_v2 = vld [vmem:[%s464_s1 + $0x28] sm:$0xff]  }
   0x2   :  { %289 = vmatprep.subr.bf16.mxu0 %v337_v0  ;;  %321 = vmatprep.subr.bf16.mxu1 %v337_v0  ;;  %v340_v3 = vld [vmem:[%s464_s1 + $0x20] sm:$0xff]   ;;  %v341_v6 = vld [vmem:[%s464_s1 + $0x18] sm:$0xff]   ;;  %v342_v7 = vld [vmem:[%s464_s1 + $0x10] sm:$0xff]  }
   0x3   :  { %290 = vmatpush3.bf16.msra.mxu0 %v337_v0  ;;  %329 = vmatpush3.bf16.msra.mxu1 %v337_v0  ;;  %v345_v4 = vld [vmem:[%s465_s0] sm:$0xff]   ;;  %v343_v8 = vld [vmem:[%s464_s1 + $0x8] sm:$0xff]   ;;  %v349_v12 = vld [vmem:[%s465_s0 + $0x10] sm:$0xff]  }
   0x4   :  { %291 = vmatprep.subr.bf16.mxu0 %v338_v1  ;;  %322 = vmatprep.subr.bf16.mxu1 %v338_v1  ;;  %v346_v5 = vld [vmem:[%s465_s0 + $0x20] sm:$0xff]   ;;  %v347_v10 = vld [vmem:[%s465_s0 + $0x8] sm:$0xff]   ;;  %v350_v13 = vld [vmem:[%s465_s0 + $0x30] sm:$0xff]  }
   0x5   :  { %305 = vmatprep.mubr.bf16.mxu0 %v345_v4  ;;  %313 = vmatprep.mubr.bf16.mxu1 %v346_v5  ;;  %v344_v9 = vld [vmem:[%s464_s1] sm:$0xff]   ;;  %v348_v11 = vld [vmem:[%s465_s0 + $0x28] sm:$0xff]   ;;  %v351_v14 = vld [vmem:[%s465_s0 + $0x18] sm:$0xff]  }
   0x6   :  { %v352_v15 = vld [vmem:[%s465_s0 + $0x38] sm:$0xff]  }
   0x7   :  { %292 = vmatpush3.bf16.msra.mxu0 %v338_v1  ;;  %330 = vmatpush3.bf16.msra.mxu1 %v338_v1 }
   0x8   :  { %293 = vmatprep.subr.bf16.mxu0 %v339_v2  ;;  %323 = vmatprep.subr.bf16.mxu1 %v339_v2 }
   0xb   :  { %294 = vmatpush3.bf16.msra.mxu0 %v339_v2  ;;  %331 = vmatpush3.bf16.msra.mxu1 %v339_v2 }
   0xc   :  { %295 = vmatprep.subr.bf16.mxu0 %v340_v3  ;;  %324 = vmatprep.subr.bf16.mxu1 %v340_v3 }
   0xf   :  { %296 = vmatpush3.bf16.msra.mxu0 %v340_v3  ;;  %332 = vmatpush3.bf16.msra.mxu1 %v340_v3 }
  0x10   :  { %297 = vmatprep.subr.bf16.mxu0 %v341_v6  ;;  %325 = vmatprep.subr.bf16.mxu1 %v341_v6 }
  0x13   :  { %298 = vmatpush3.bf16.msra.mxu0 %v341_v6  ;;  %333 = vmatpush3.bf16.msra.mxu1 %v341_v6 }
  0x14   :  { %299 = vmatprep.subr.bf16.mxu0 %v342_v7  ;;  %326 = vmatprep.subr.bf16.mxu1 %v342_v7 }
  0x17   :  { %300 = vmatpush3.bf16.msra.mxu0 %v342_v7  ;;  %334 = vmatpush3.bf16.msra.mxu1 %v342_v7 }
  0x18   :  { %301 = vmatprep.subr.bf16.mxu0 %v343_v8  ;;  %327 = vmatprep.subr.bf16.mxu1 %v343_v8 }
  0x1b   :  { %302 = vmatpush3.bf16.msra.mxu0 %v343_v8  ;;  %335 = vmatpush3.bf16.msra.mxu1 %v343_v8 }
  0x1c   :  { %303 = vmatprep.subr.bf16.mxu0 %v344_v9  ;;  %328 = vmatprep.subr.bf16.mxu1 %v344_v9 }
  0x1f   :  { %304 = vmatpush3.bf16.msra.mxu0 %v344_v9  ;;  %336 = vmatpush3.bf16.msra.mxu1 %v344_v9 }
  0x22   :  { %306 = vmatmul.mubr.bf16.vlgmr.msra.gmra.mxu0 %v347_v10  ;;  %314 = vmatmul.mubr.bf16.vlgmr.msra.gmra.mxu1 %v348_v11 }
  0x23   :  { %309 = vmatprep.mubr.bf16.mxu0 %v349_v12  ;;  %317 = vmatprep.mubr.bf16.mxu1 %v350_v13 }
  0x2a   :  { %310 = vmatmul.mubr.bf16.gmra.mxu0 %v351_v14  ;;  %318 = vmatmul.mubr.bf16.gmra.mxu1 %v352_v15 }
  0xe2   :  { %v307_v16 = vpop.f32.mrf.mxu0  ;;  %v315_v17 = vpop.f32.mrf.mxu1 }
  0xe3   :  { %239 = vst [vmem:[%s466_s2 + $0x10] sm:$0xff] %v307_v16  ;;  %247 = vst [vmem:[%s466_s2 + $0x50] sm:$0xff] %v315_v17 }
  0xe4   :  { %v174_v18 = vpop.f32.mrf.mxu0  ;;  %v206_v19 = vpop.f32.mrf.mxu1 }
  0xe5   :  { %237 = vst [vmem:[%s466_s2] sm:$0xff] %v174_v18  ;;  %245 = vst [vmem:[%s466_s2 + $0x40] sm:$0xff] %v206_v19 }
  0xe6   :  { %v308_v20 = vpop.f32.mrf.mxu0  ;;  %v316_v21 = vpop.f32.mrf.mxu1 }
  0xe7   :  { %240 = vst [vmem:[%s466_s2 + $0x18] sm:$0xff] %v308_v20  ;;  %248 = vst [vmem:[%s466_s2 + $0x58] sm:$0xff] %v316_v21 }
  0xe8   :  { %v177_v22 = vpop.f32.mrf.mxu0  ;;  %v209_v23 = vpop.f32.mrf.mxu1 }
  0xe9   :  { %238 = vst [vmem:[%s466_s2 + $0x8] sm:$0xff] %v177_v22  ;;  %246 = vst [vmem:[%s466_s2 + $0x48] sm:$0xff] %v209_v23 }
  0xea   :  { %v311_v24 = vpop.f32.mrf.mxu0  ;;  %v319_v25 = vpop.f32.mrf.mxu1 }
  0xeb   :  { %243 = vst [vmem:[%s466_s2 + $0x30] sm:$0xff] %v311_v24  ;;  %251 = vst [vmem:[%s466_s2 + $0x70] sm:$0xff] %v319_v25 }
  0xec   :  { %v190_v26 = vpop.f32.mrf.mxu0  ;;  %v222_v27 = vpop.f32.mrf.mxu1 }
  0xed   :  { %241 = vst [vmem:[%s466_s2 + $0x20] sm:$0xff] %v190_v26  ;;  %249 = vst [vmem:[%s466_s2 + $0x60] sm:$0xff] %v222_v27 }
  0xee   :  { %v312_v28 = vpop.f32.mrf.mxu0  ;;  %v320_v29 = vpop.f32.mrf.mxu1 }
  0xef   :  { %244 = vst [vmem:[%s466_s2 + $0x38] sm:$0xff] %v312_v28  ;;  %252 = vst [vmem:[%s466_s2 + $0x78] sm:$0xff] %v320_v29 }
  0xf0   :  { %v193_v30 = vpop.f32.mrf.mxu0  ;;  %v225_v31 = vpop.f32.mrf.mxu1 }
  0xf1   :  { %242 = vst [vmem:[%s466_s2 + $0x28] sm:$0xff] %v193_v30  ;;  %250 = vst [vmem:[%s466_s2 + $0x68] sm:$0xff] %v225_v31 }

// kernel: gta_g_forward.15
= control target key start
LH: loop header
LB: loop body
LE: loop exit
PB: predicated region body
PF: predicated region fallthrough
CT: control target
= control target key end

     0   :  { %s540_s0 = inlined_call_operand.vmem [shape: f32[128,128], index: 0, kind: input, shape index: {}]   ;;  %s541_s1 = inlined_call_operand.vmem [shape: f32[1,128], index: 1, kind: input, shape index: {}]   ;;  %s542_s2 = inlined_call_operand.vmem [shape: f32[1,128], index: 2, kind: input, shape index: {}]   ;;  %s543_s3 = inlined_call_operand.vmem [shape: bf16[128,128], index: 3, kind: output, shape index: {}]  }
   0x1   :  { %v364_v0 = vld [vmem:[%s540_s0] sm:$0xff]  ;;  %v369_v1 = vld [vmem:[%s540_s0 + $0x8] sm:$0xff]  ;;  %v374_v2 = vld [vmem:[%s540_s0 + $0x10] sm:$0xff] }
   0x2   :  { %v30_v3 = vadd.f32 %v369_v1, %v364_v0  ;;  %v381_v4 = vld [vmem:[%s540_s0 + $0x18] sm:$0xff]  ;;  %v387_v6 = vld [vmem:[%s540_s0 + $0x20] sm:$0xff]  ;;  %v393_v8 = vld [vmem:[%s540_s0 + $0x28] sm:$0xff] }
   0x3   :  { %v399_v10 = vld [vmem:[%s540_s0 + $0x30] sm:$0xff]  ;;  %v405_v12 = vld [vmem:[%s540_s0 + $0x38] sm:$0xff]  ;;  %v411_v14 = vld [vmem:[%s540_s0 + $0x40] sm:$0xff] }
   0x4   :  { %v31_v5 = vadd.f32 %v30_v3, %v374_v2  ;;  %v417_v16 = vld [vmem:[%s540_s0 + $0x48] sm:$0xff]  ;;  %v423_v18 = vld [vmem:[%s540_s0 + $0x50] sm:$0xff]  ;;  %v429_v20 = vld [vmem:[%s540_s0 + $0x58] sm:$0xff] }
   0x5   :  { %v435_v22 = vld [vmem:[%s540_s0 + $0x60] sm:$0xff]  ;;  %v441_v24 = vld [vmem:[%s540_s0 + $0x68] sm:$0xff]  ;;  %v447_v26 = vld [vmem:[%s540_s0 + $0x70] sm:$0xff] }
   0x6   :  { %v32_v7 = vadd.f32 %v31_v5, %v381_v4  ;;  %v453_v28 = vld [vmem:[%s540_s0 + $0x78] sm:$0xff] }
   0x8   :  { %v33_v9 = vadd.f32 %v32_v7, %v387_v6 }
   0xa   :  { %v34_v11 = vadd.f32 %v33_v9, %v393_v8 }
   0xc   :  { %v35_v13 = vadd.f32 %v34_v11, %v399_v10 }
   0xe   :  { %v36_v15 = vadd.f32 %v35_v13, %v405_v12 }
  0x10   :  { %v37_v17 = vadd.f32 %v36_v15, %v411_v14 }
  0x12   :  { %v38_v19 = vadd.f32 %v37_v17, %v417_v16 }
  0x14   :  { %v39_v21 = vadd.f32 %v38_v19, %v423_v18 }
  0x16   :  { %v40_v23 = vadd.f32 %v39_v21, %v429_v20 }
  0x18   :  { %v41_v25 = vadd.f32 %v40_v23, %v435_v22 }
  0x1a   :  { %v42_v27 = vadd.f32 %v41_v25, %v441_v24 }
  0x1c   :  { %v43_v29 = vadd.f32 %v42_v27, %v447_v26 }
  0x1e   :  { %v44_v30 = vadd.f32 %v43_v29, %v453_v28 }
  0x20   :  { %v45_v31 = vrot.slane %v44_v30, 4 }
  0x22   :  { %v46_v32 = vadd.f32 %v45_v31, %v44_v30 }
  0x24   :  { %v47_v33 = vrot.slane %v46_v32, 2 }
  0x26   :  { %v48_v34 = vadd.f32 %v47_v33, %v46_v32 }
  0x28   :  { %v49_v35 = vrot.slane %v48_v34, 1 }
  0x2a   :  { %v50_v36 = vadd.f32 %v49_v35, %v48_v34 }
  0x2c   :  { %v457_v37 = vmul.f32 0.0078125, %v50_v36 }
  0x2e   :  { %v52_v38 = vsub.f32 %v364_v0, %v457_v37  ;;  %v53_v39 = vsub.f32 %v369_v1, %v457_v37  ;;  %v54_v40 = vsub.f32 %v374_v2, %v457_v37  ;;  %v55_v41 = vsub.f32 %v381_v4, %v457_v37 }
  0x2f   :  { %v56_v44 = vsub.f32 %v387_v6, %v457_v37  ;;  %v57_v46 = vsub.f32 %v393_v8, %v457_v37  ;;  %v58_v49 = vsub.f32 %v399_v10, %v457_v37  ;;  %v59_v52 = vsub.f32 %v405_v12, %v457_v37 }
  0x30   :  { %v68_v42 = vmul.f32 %v52_v38, %v52_v38  ;;  %v69_v43 = vmul.f32 %v53_v39, %v53_v39  ;;  %v70_v45 = vmul.f32 %v54_v40, %v54_v40  ;;  %v71_v47 = vmul.f32 %v55_v41, %v55_v41 }
  0x31   :  { %v72_v50 = vmul.f32 %v56_v44, %v56_v44  ;;  %v73_v53 = vmul.f32 %v57_v46, %v57_v46  ;;  %v60_v55 = vsub.f32 %v411_v14, %v457_v37  ;;  %v74_v56 = vmul.f32 %v58_v49, %v58_v49 }
  0x32   :  { %v84_v48 = vadd.f32 %v69_v43, %v68_v42  ;;  %v61_v58 = vsub.f32 %v417_v16, %v457_v37  ;;  %v75_v59 = vmul.f32 %v59_v52, %v59_v52  ;;  %v62_v61 = vsub.f32 %v423_v18, %v457_v37 }
  0x33   :  { %v76_v62 = vmul.f32 %v60_v55, %v60_v55  ;;  %v63_v3 = vsub.f32 %v429_v20, %v457_v37  ;;  %v64_v9 = vsub.f32 %v435_v22, %v457_v37  ;;  %v65_v15 = vsub.f32 %v441_v24, %v457_v37  ;;  %v113_v55 = vld [vmem:[%s542_s2] sm:$0x1] }
  0x34   :  { %v85_v51 = vadd.f32 %v84_v48, %v70_v45  ;;  %v77_v5 = vmul.f32 %v61_v58, %v61_v58  ;;  %v78_v11 = vmul.f32 %v62_v61, %v62_v61  ;;  %v66_v21 = vsub.f32 %v447_v26, %v457_v37 }
  0x35   :  { %v79_v17 = vmul.f32 %v63_v3, %v63_v3  ;;  %v80_v23 = vmul.f32 %v64_v9, %v64_v9  ;;  %v67_v27 = vsub.f32 %v453_v28, %v457_v37  ;;  %v81_v29 = vmul.f32 %v65_v15, %v65_v15 }
  0x36   :  { %v86_v54 = vadd.f32 %v85_v51, %v71_v47  ;;  %v82_v31 = vmul.f32 %v66_v21, %v66_v21  ;;  %v105_v41 = vmul.f32 0.0, %v457_v37  ;;  %v117_v49 = vlaneseq  ;;  %v111_v51 = vld [vmem:[%s541_s1] sm:$0x1] }
  0x37   :  { %v83_v33 = vmul.f32 %v67_v27, %v67_v27 }
  0x38   :  { %v87_v57 = vadd.f32 %v86_v54, %v72_v50  ;;  %v106_v44 = vmul.f32 %v105_v41, %v457_v37  ;;  %v118_v50 = vshrl.u32 %v117_v49, 7 }
  0x3a   :  { %v88_v60 = vadd.f32 %v87_v57, %v73_v53  ;;  %v119_v52 = vsub.s32 0, %v118_v50 }
  0x3c   :  { %v89_v63 = vadd.f32 %v88_v60, %v74_v56 }
  0x3e   :  { %v90_v7 = vadd.f32 %v89_v63, %v75_v59 }
  0x40   :  { %v91_v13 = vadd.f32 %v90_v7, %v76_v62 }
  0x42   :  { %v92_v19 = vadd.f32 %v91_v13, %v77_v5 }
  0x44   :  { %v93_v25 = vadd.f32 %v92_v19, %v78_v11 }
  0x46   :  { %v94_v30 = vadd.f32 %v93_v25, %v79_v17 }
  0x48   :  { %v95_v32 = vadd.f32 %v94_v30, %v80_v23 }
  0x4a   :  { %v96_v34 = vadd.f32 %v95_v32, %v81_v29 }
  0x4c   :  { %v97_v35 = vadd.f32 %v96_v34, %v82_v31 }
  0x4e   :  { %v98_v36 = vadd.f32 %v97_v35, %v83_v33 }
  0x50   :  { %v99_v38 = vrot.slane %v98_v36, 4 }
  0x52   :  { %v100_v39 = vadd.f32 %v99_v38, %v98_v36 }
  0x54   :  { %v101_v40 = vrot.slane %v100_v39, 2 }
  0x56   :  { %v102_v42 = vadd.f32 %v101_v40, %v100_v39 }
  0x58   :  { %v103_v43 = vrot.slane %v102_v42, 1 }
  0x5a   :  { %v104_v45 = vadd.f32 %v103_v43, %v102_v42 }
  0x5c   :  { %v107_v46 = vsub.f32 %v104_v45, %v106_v44 }
  0x5e   :  { %v108_v47 = vmul.f32 0.0078125, %v107_v46 }
  0x60   :  { %v109_v48 = vadd.f32 1e-05, %v108_v47 }
  0x62   :  { %339 = vrsqrt.f32 %v109_v48 }
  0x6f   :  { %v340_v53 = vpop.eup %339 }
  0x70   :  { %v112_v54 = vmul.f32 %v340_v53, %v111_v51 }
  0x72   :  { %v114_v56 = vmul.f32 %v112_v54, %v457_v37  ;;  %v120_v57 = vrot.slane %v112_v54, %v119_v52 }
  0x74   :  { %v115_v58 = vsub.f32 %v113_v55, %v114_v56  ;;  %v122_v59 = vmul.f32 %v120_v57, %v364_v0  ;;  %v123_v60 = vmul.f32 %v120_v57, %v369_v1  ;;  %v124_v61 = vmul.f32 %v120_v57, %v374_v2 }
  0x75   :  { %v125_v62 = vmul.f32 %v120_v57, %v381_v4  ;;  %v126_v63 = vmul.f32 %v120_v57, %v387_v6  ;;  %v127_v3 = vmul.f32 %v120_v57, %v393_v8  ;;  %v128_v5 = vmul.f32 %v120_v57, %v399_v10 }
  0x76   :  { %v142_v7 = vrot.slane %v115_v58, %v119_v52  ;;  %v129_v9 = vmul.f32 %v120_v57, %v405_v12  ;;  %v130_v37 = vmul.f32 %v120_v57, %v411_v14  ;;  %v131_v11 = vmul.f32 %v120_v57, %v417_v16 }
  0x77   :  { %v132_v0 = vmul.f32 %v120_v57, %v423_v18  ;;  %v133_v1 = vmul.f32 %v120_v57, %v429_v20  ;;  %v134_v2 = vmul.f32 %v120_v57, %v435_v22  ;;  %v135_v4 = vmul.f32 %v120_v57, %v441_v24 }
  0x78   :  { %v144_v6 = vadd.f32 %v142_v7, %v122_v59  ;;  %v145_v13 = vadd.f32 %v142_v7, %v123_v60  ;;  %v146_v8 = vadd.f32 %v142_v7, %v124_v61  ;;  %v147_v15 = vadd.f32 %v142_v7, %v125_v62 }
  0x79   :  { %v148_v10 = vadd.f32 %v142_v7, %v126_v63  ;;  %v149_v17 = vadd.f32 %v142_v7, %v127_v3  ;;  %v150_v19 = vadd.f32 %v142_v7, %v128_v5  ;;  %v151_v12 = vadd.f32 %v142_v7, %v129_v9 }
  0x7a   :  { %v160_v21 = vmax.f32 %v144_v6, 0.0  ;;  %v161_v14 = vmax.f32 %v145_v13, 0.0  ;;  %v162_v23 = vmax.f32 %v146_v8, 0.0  ;;  %v163_v16 = vmax.f32 %v147_v15, 0.0 }
  0x7b   :  { %v164_v25 = vmax.f32 %v148_v10, 0.0  ;;  %v165_v18 = vmax.f32 %v149_v17, 0.0  ;;  %v166_v27 = vmax.f32 %v150_v19, 0.0  ;;  %v167_v20 = vmax.f32 %v151_v12, 0.0 }
  0x7c   :  { %v295_v29 = vpack.c.bf16 %v161_v14, %v160_v21  ;;  %v300_v22 = vpack.c.bf16 %v163_v16, %v162_v23  ;;  %v152_v30 = vadd.f32 %v142_v7, %v130_v37  ;;  %v153_v24 = vadd.f32 %v142_v7, %v131_v11 }
  0x7d   :  { %v305_v31 = vpack.c.bf16 %v165_v18, %v164_v25  ;;  %v310_v32 = vpack.c.bf16 %v167_v20, %v166_v27  ;;  %v154_v33 = vadd.f32 %v142_v7, %v132_v0  ;;  %v155_v34 = vadd.f32 %v142_v7, %v133_v1 }
  0x7e   :  { %296 = vst [vmem:[%s543_s3] sm:$0xff] %v295_v29   ;;  %332 = vst [vmem:[%s543_s3 + $0x8] sm:$0xff] %v300_v22   ;;  %v168_v35 = vmax.f32 %v152_v30, 0.0  ;;  %v169_v36 = vmax.f32 %v153_v24, 0.0  ;;  %v156_v38 = vadd.f32 %v142_v7, %v134_v2  ;;  %v157_v39 = vadd.f32 %v142_v7, %v135_v4 }
  0x7f   :  { %333 = vst [vmem:[%s543_s3 + $0x10] sm:$0xff] %v305_v31   ;;  %334 = vst [vmem:[%s543_s3 + $0x18] sm:$0xff] %v310_v32   ;;  %v170_v40 = vmax.f32 %v154_v33, 0.0  ;;  %v171_v41 = vmax.f32 %v155_v34, 0.0  ;;  %v136_v42 = vmul.f32 %v120_v57, %v447_v26  ;;  %v137_v43 = vmul.f32 %v120_v57, %v453_v28 }
  0x80   :  { %v315_v44 = vpack.c.bf16 %v169_v36, %v168_v35  ;;  %v172_v45 = vmax.f32 %v156_v38, 0.0  ;;  %v173_v46 = vmax.f32 %v157_v39, 0.0 }
  0x81   :  { %v320_v47 = vpack.c.bf16 %v171_v41, %v170_v40  ;;  %v158_v48 = vadd.f32 %v142_v7, %v136_v42  ;;  %v159_v49 = vadd.f32 %v142_v7, %v137_v43 }
  0x82   :  { %335 = vst [vmem:[%s543_s3 + $0x20] sm:$0xff] %v315_v44   ;;  %v325_v50 = vpack.c.bf16 %v173_v46, %v172_v45 }
  0x83   :  { %336 = vst [vmem:[%s543_s3 + $0x28] sm:$0xff] %v320_v47   ;;  %v174_v51 = vmax.f32 %v158_v48, 0.0  ;;  %v175_v52 = vmax.f32 %v159_v49, 0.0 }
  0x84   :  { %337 = vst [vmem:[%s543_s3 + $0x30] sm:$0xff] %v325_v50  }
  0x85   :  { %v330_v26 = vpack.c.bf16 %v175_v52, %v174_v51 }
  0x87   :  { %338 = vst [vmem:[%s543_s3 + $0x38] sm:$0xff] %v330_v26  }

// kernel: gta_g_forward.18
= control target key start
LH: loop header
LB: loop body
LE: loop exit
PB: predicated region body
PF: predicated region fallthrough
CT: control target
= control target key end

     0   :  { %s767_s9 = smov 0   ;;  %s864_s0 = inlined_call_operand.vmem [shape: bf16[512,128], index: 0, kind: input, shape index: {}]   ;;  %s865_s1 = inlined_call_operand.vmem [shape: bf16[128,128], index: 1, kind: input, shape index: {}]   ;;  %s866_s2 = inlined_call_operand.vmem [shape: f32[512,128], index: 2, kind: output, shape index: {}]  }
   0x1 LB: > { %s589_s10 = sadd.s32 4294967295, %s750_s9   ;;  %p593_p0 = scmp.ge.s32.totalorder %s750_s9, 1  ;;  %s750_s9 = sphi %s767_s9, %s12_s9  }
   0x2   : > { %p113_p1 = scmp.lt.s32.totalorder %s750_s9, 3 }
   0x4   : > { %p114_p2 = pnand %p593_p0, %p113_p1 }
   0x5   : > { %s594_s13 = sshll.u32 (!%p114_p2), %s589_s10, 5 }
   0x6   : > { %117 = sbr.rel (%p114_p2) target bundleno = 268 (0x10c), region = 28  ;;  %p136_p3 = scmp.lt.s32.totalorder (!%p114_p2), %s594_s13, 63 }
   0xb   : > { %v720_v0 = vld [vmem:[%s865_s1 + $0x38] sm:$0xff]   ;;  %v721_v1 = vld [vmem:[%s865_s1 + $0x30] sm:$0xff]   ;;  %s868_s13 = smov (!%p136_p3, %s594_s13), 63  ;;  %v722_v2 = vld [vmem:[%s865_s1 + $0x28] sm:$0xff]  }
   0xc   : > { %648 = vmatprep.subr.bf16.mxu0 %v720_v0  ;;  %696 = vmatprep.subr.bf16.mxu1 %v720_v0  ;;  %s595_s18 = sshll.u32 %s868_s13, 2  ;;  %v723_v3 = vld [vmem:[%s865_s1 + $0x20] sm:$0xff]   ;;  %v724_v6 = vld [vmem:[%s865_s1 + $0x18] sm:$0xff]   ;;  %v725_v7 = vld [vmem:[%s865_s1 + $0x10] sm:$0xff]   ;;  %s597_s4 = sshll.u32 %s868_s13, 3 }
   0xd   : > { %649 = vmatpush3.bf16.msra.mxu0 %v720_v0  ;;  %704 = vmatpush3.bf16.msra.mxu1 %v720_v0  ;;  %s790_s21 = scalar_lea.vmem %s864_s0, %s595_s18  ;;  %v726_v8 = vld [vmem:[%s865_s1 + $0x8] sm:$0xff]   ;;  %v727_v9 = vld [vmem:[%s865_s1] sm:$0xff]   ;;  %s827_s7 = scalar_lea.vmem %s866_s2, %s597_s4 }
   0xe   : > { %650 = vmatprep.subr.bf16.mxu0 %v721_v1  ;;  %697 = vmatprep.subr.bf16.mxu1 %v721_v1  ;;  %v728_v4 = vld [vmem:[%s790_s21] sm:$0xff]   ;;  %v730_v10 = vld [vmem:[%s790_s21 + $0x8] sm:$0xff]   ;;  %v732_v12 = vld [vmem:[%s790_s21 + $0x10] sm:$0xff]  }
   0xf   : > { %v729_v5 = vld [vmem:[%s790_s21 + $0x40] sm:$0xff]   ;;  %664 = vmatprep.mubr.bf16.mxu0 %v728_v4  ;;  %v731_v11 = vld [vmem:[%s790_s21 + $0x48] sm:$0xff]   ;;  %v733_v13 = vld [vmem:[%s790_s21 + $0x50] sm:$0xff]  }
  0x10   : > { %680 = vmatprep.mubr.bf16.mxu1 %v729_v5  ;;  %v734_v14 = vld [vmem:[%s790_s21 + $0x18] sm:$0xff]   ;;  %v736_v16 = vld [vmem:[%s790_s21 + $0x20] sm:$0xff]   ;;  %v738_v18 = vld [vmem:[%s790_s21 + $0x28] sm:$0xff]  }
  0x11   : > { %651 = vmatpush3.bf16.msra.mxu0 %v721_v1  ;;  %705 = vmatpush3.bf16.msra.mxu1 %v721_v1  ;;  %v735_v15 = vld [vmem:[%s790_s21 + $0x58] sm:$0xff]   ;;  %v737_v17 = vld [vmem:[%s790_s21 + $0x60] sm:$0xff]   ;;  %v739_v19 = vld [vmem:[%s790_s21 + $0x68] sm:$0xff]  }
  0x12   : > { %652 = vmatprep.subr.bf16.mxu0 %v722_v2  ;;  %698 = vmatprep.subr.bf16.mxu1 %v722_v2  ;;  %v740_v20 = vld [vmem:[%s790_s21 + $0x30] sm:$0xff]   ;;  %v742_v22 = vld [vmem:[%s790_s21 + $0x38] sm:$0xff]  }
  0x13   : > { %v741_v21 = vld [vmem:[%s790_s21 + $0x70] sm:$0xff]   ;;  %v743_v23 = vld [vmem:[%s790_s21 + $0x78] sm:$0xff]  }
  0x15   : > { %653 = vmatpush3.bf16.msra.mxu0 %v722_v2  ;;  %706 = vmatpush3.bf16.msra.mxu1 %v722_v2 }
  0x16   : > { %654 = vmatprep.subr.bf16.mxu0 %v723_v3  ;;  %699 = vmatprep.subr.bf16.mxu1 %v723_v3 }
  0x19   : > { %655 = vmatpush3.bf16.msra.mxu0 %v723_v3  ;;  %707 = vmatpush3.bf16.msra.mxu1 %v723_v3 }
  0x1a   : > { %656 = vmatprep.subr.bf16.mxu0 %v724_v6  ;;  %700 = vmatprep.subr.bf16.mxu1 %v724_v6 }
  0x1d   : > { %657 = vmatpush3.bf16.msra.mxu0 %v724_v6  ;;  %708 = vmatpush3.bf16.msra.mxu1 %v724_v6 }
  0x1e   : > { %658 = vmatprep.subr.bf16.mxu0 %v725_v7  ;;  %701 = vmatprep.subr.bf16.mxu1 %v725_v7 }
  0x21   : > { %659 = vmatpush3.bf16.msra.mxu0 %v725_v7  ;;  %709 = vmatpush3.bf16.msra.mxu1 %v725_v7 }
  0x22   : > { %660 = vmatprep.subr.bf16.mxu0 %v726_v8  ;;  %702 = vmatprep.subr.bf16.mxu1 %v726_v8 }
  0x25   : > { %661 = vmatpush3.bf16.msra.mxu0 %v726_v8  ;;  %710 = vmatpush3.bf16.msra.mxu1 %v726_v8 }
  0x26   : > { %662 = vmatprep.subr.bf16.mxu0 %v727_v9  ;;  %703 = vmatprep.subr.bf16.mxu1 %v727_v9 }
  0x29   : > { %663 = vmatpush3.bf16.msra.mxu0 %v727_v9  ;;  %711 = vmatpush3.bf16.msra.mxu1 %v727_v9 }
  0x2c   : > { %665 = vmatmul.mubr.bf16.vlgmr.msra.gmra.mxu0 %v730_v10  ;;  %681 = vmatmul.mubr.bf16.vlgmr.msra.gmra.mxu1 %v731_v11 }
  0x2d   : > { %668 = vmatprep.mubr.bf16.mxu0 %v732_v12  ;;  %684 = vmatprep.mubr.bf16.mxu1 %v733_v13 }
  0x34   : > { %669 = vmatmul.mubr.bf16.gmra.mxu0 %v734_v14  ;;  %685 = vmatmul.mubr.bf16.gmra.mxu1 %v735_v15 }
  0x35   : > { %672 = vmatprep.mubr.bf16.mxu0 %v736_v16  ;;  %688 = vmatprep.mubr.bf16.mxu1 %v737_v17 }
  0x3c   : > { %673 = vmatmul.mubr.bf16.gmra.mxu0 %v738_v18  ;;  %689 = vmatmul.mubr.bf16.gmra.mxu1 %v739_v19 }
  0x3d   : > { %676 = vmatprep.mubr.bf16.mxu0 %v740_v20  ;;  %692 = vmatprep.mubr.bf16.mxu1 %v741_v21 }
  0x44   : > { %677 = vmatmul.mubr.bf16.gmra.mxu0 %v742_v22  ;;  %693 = vmatmul.mubr.bf16.gmra.mxu1 %v743_v23 }
  0xec   : > { %v666_v24 = vpop.f32.mrf.mxu0  ;;  %v682_v25 = vpop.f32.mrf.mxu1 }
  0xed   : > { %503 = vst [vmem:[%s827_s7 + $0x10] sm:$0xff] %v666_v24  ;;  %519 = vst [vmem:[%s827_s7 + $0x90] sm:$0xff] %v682_v25 }
  0xee   : > { %v374_v26 = vpop.f32.mrf.mxu0  ;;  %v438_v27 = vpop.f32.mrf.mxu1 }
  0xef   : > { %501 = vst [vmem:[%s827_s7] sm:$0xff] %v374_v26  ;;  %517 = vst [vmem:[%s827_s7 + $0x80] sm:$0xff] %v438_v27 }
  0xf0   : > { %v667_v28 = vpop.f32.mrf.mxu0  ;;  %v683_v29 = vpop.f32.mrf.mxu1 }
  0xf1   : > { %504 = vst [vmem:[%s827_s7 + $0x18] sm:$0xff] %v667_v28  ;;  %520 = vst [vmem:[%s827_s7 + $0x98] sm:$0xff] %v683_v29 }
  0xf2   : > { %v377_v30 = vpop.f32.mrf.mxu0  ;;  %v441_v31 = vpop.f32.mrf.mxu1 }
  0xf3   : > { %502 = vst [vmem:[%s827_s7 + $0x8] sm:$0xff] %v377_v30  ;;  %518 = vst [vmem:[%s827_s7 + $0x88] sm:$0xff] %v441_v31 }
  0xf4   : > { %v670_v32 = vpop.f32.mrf.mxu0  ;;  %v686_v33 = vpop.f32.mrf.mxu1 }
  0xf5   : > { %507 = vst [vmem:[%s827_s7 + $0x30] sm:$0xff] %v670_v32  ;;  %523 = vst [vmem:[%s827_s7 + $0xb0] sm:$0xff] %v686_v33 }
  0xf6   : > { %v390_v34 = vpop.f32.mrf.mxu0  ;;  %v454_v35 = vpop.f32.mrf.mxu1 }
  0xf7   : > { %505 = vst [vmem:[%s827_s7 + $0x20] sm:$0xff] %v390_v34  ;;  %521 = vst [vmem:[%s827_s7 + $0xa0] sm:$0xff] %v454_v35 }
  0xf8   : > { %v671_v36 = vpop.f32.mrf.mxu0  ;;  %v687_v37 = vpop.f32.mrf.mxu1 }
  0xf9   : > { %508 = vst [vmem:[%s827_s7 + $0x38] sm:$0xff] %v671_v36  ;;  %524 = vst [vmem:[%s827_s7 + $0xb8] sm:$0xff] %v687_v37 }
  0xfa   : > { %v393_v38 = vpop.f32.mrf.mxu0  ;;  %v457_v39 = vpop.f32.mrf.mxu1 }
  0xfb   : > { %506 = vst [vmem:[%s827_s7 + $0x28] sm:$0xff] %v393_v38  ;;  %522 = vst [vmem:[%s827_s7 + $0xa8] sm:$0xff] %v457_v39 }
  0xfc   : > { %v674_v40 = vpop.f32.mrf.mxu0  ;;  %v690_v41 = vpop.f32.mrf.mxu1 }
  0xfd   : > { %511 = vst [vmem:[%s827_s7 + $0x50] sm:$0xff] %v674_v40  ;;  %527 = vst [vmem:[%s827_s7 + $0xd0] sm:$0xff] %v690_v41 }
  0xfe   : > { %v406_v42 = vpop.f32.mrf.mxu0  ;;  %v470_v43 = vpop.f32.mrf.mxu1 }
  0xff   : > { %509 = vst [vmem:[%s827_s7 + $0x40] sm:$0xff] %v406_v42  ;;  %525 = vst [vmem:[%s827_s7 + $0xc0] sm:$0xff] %v470_v43 }
 0x100   : > { %v675_v44 = vpop.f32.mrf.mxu0  ;;  %v691_v45 = vpop.f32.mrf.mxu1 }
 0x101   : > { %512 = vst [vmem:[%s827_s7 + $0x58] sm:$0xff] %v675_v44  ;;  %528 = vst [vmem:[%s827_s7 + $0xd8] sm:$0xff] %v691_v45 }
 0x102   : > { %v409_v46 = vpop.f32.mrf.mxu0  ;;  %v473_v47 = vpop.f32.mrf.mxu1 }
 0x103   : > { %510 = vst [vmem:[%s827_s7 + $0x48] sm:$0xff] %v409_v46  ;;  %526 = vst [vmem:[%s827_s7 + $0xc8] sm:$0xff] %v473_v47 }
 0x104   : > { %v678_v48 = vpop.f32.mrf.mxu0  ;;  %v694_v49 = vpop.f32.mrf.mxu1 }
 0x105   : > { %515 = vst [vmem:[%s827_s7 + $0x70] sm:$0xff] %v678_v48  ;;  %531 = vst [vmem:[%s827_s7 + $0xf0] sm:$0xff] %v694_v49 }
 0x106   : > { %v422_v50 = vpop.f32.mrf.mxu0  ;;  %v486_v51 = vpop.f32.mrf.mxu1 }
 0x107   : > { %513 = vst [vmem:[%s827_s7 + $0x60] sm:$0xff] %v422_v50  ;;  %529 = vst [vmem:[%s827_s7 + $0xe0] sm:$0xff] %v486_v51 }
 0x108   : > { %v679_v52 = vpop.f32.mrf.mxu0  ;;  %v695_v53 = vpop.f32.mrf.mxu1 }
 0x109   : > { %516 = vst [vmem:[%s827_s7 + $0x78] sm:$0xff] %v679_v52  ;;  %532 = vst [vmem:[%s827_s7 + $0xf8] sm:$0xff] %v695_v53 }
 0x10a   : > { %v425_v54 = vpop.f32.mrf.mxu0  ;;  %v489_v55 = vpop.f32.mrf.mxu1 }
 0x10b   : > { %514 = vst [vmem:[%s827_s7 + $0x68] sm:$0xff] %v425_v54  ;;  %530 = vst [vmem:[%s827_s7 + $0xe8] sm:$0xff] %v489_v55 }
 0x10c PF: > { %s12_s9 = sadd.s32 1, %s750_s9  }
 0x10d   : > { %p9_p4 = scmp.ge.s32.totalorder %s12_s9, 4  }
 0x10f   :  { %11 = sbr.rel (!%p9_p4) target bundleno = 1 (0x1), region = 58 }

// kernel: gta_g_forward.17
= control target key start
LH: loop header
LB: loop body
LE: loop exit
PB: predicated region body
PF: predicated region fallthrough
CT: control target
= control target key end

     0   :  { %s2040_s0 = inlined_call_operand.vmem [shape: f32[512,128], index: 0, kind: input, shape index: {}]   ;;  %s2041_s1 = inlined_call_operand.vmem [shape: f32[1,128], index: 1, kind: input, shape index: {}]   ;;  %s2042_s2 = inlined_call_operand.vmem [shape: f32[1,128], index: 2, kind: input, shape index: {}]   ;;  %s2043_s3 = inlined_call_operand.vmem [shape: bf16[512,128], index: 3, kind: output, shape index: {}]  }
   0x1   :  { %v1228_v0 = vld [vmem:[%s2040_s0] sm:$0xff]  ;;  %v1233_v1 = vld [vmem:[%s2040_s0 + $0x8] sm:$0xff]  ;;  %v1238_v2 = vld [vmem:[%s2040_s0 + $0x10] sm:$0xff] }
   0x2   :  { %2082 = vst [vmem:[#allocation2_spill] sm:$0xff] %v1228_v0  ;;  %2083 = vst [vmem:[#allocation3_spill] sm:$0xff] %v1233_v1  ;;  %v78_v3 = vadd.f32 %v1233_v1, %v1228_v0  ;;  %v1245_v4 = vld [vmem:[%s2040_s0 + $0x18] sm:$0xff]  ;;  %v1251_v6 = vld [vmem:[%s2040_s0 + $0x20] sm:$0xff] }
   0x3   :  { %2084 = vst [vmem:[#allocation4_spill] sm:$0xff] %v1238_v2  ;;  %2085 = vst [vmem:[#allocation5_spill] sm:$0xff] %v1245_v4  ;;  %v1257_v8 = vld [vmem:[%s2040_s0 + $0x28] sm:$0xff]  ;;  %v1263_v10 = vld [vmem:[%s2040_s0 + $0x30] sm:$0xff] }
   0x4   :  { %v79_v5 = vadd.f32 %v78_v3, %v1238_v2  ;;  %2086 = vst [vmem:[#allocation6_spill] sm:$0xff] %v1251_v6  ;;  %2087 = vst [vmem:[#allocation7_spill] sm:$0xff] %v1257_v8  ;;  %v1269_v12 = vld [vmem:[%s2040_s0 + $0x38] sm:$0xff]  ;;  %v1275_v14 = vld [vmem:[%s2040_s0 + $0x40] sm:$0xff] }
   0x5   :  { %v1281_v16 = vld [vmem:[%s2040_s0 + $0x48] sm:$0xff]  ;;  %v1287_v18 = vld [vmem:[%s2040_s0 + $0x50] sm:$0xff]  ;;  %v1293_v20 = vld [vmem:[%s2040_s0 + $0x58] sm:$0xff] }
   0x6   :  { %v80_v7 = vadd.f32 %v79_v5, %v1245_v4  ;;  %v1299_v22 = vld [vmem:[%s2040_s0 + $0x60] sm:$0xff]  ;;  %v1305_v24 = vld [vmem:[%s2040_s0 + $0x68] sm:$0xff]  ;;  %v1311_v26 = vld [vmem:[%s2040_s0 + $0x70] sm:$0xff] }
   0x7   :  { %v1317_v28 = vld [vmem:[%s2040_s0 + $0x78] sm:$0xff]  ;;  %v1323_v30 = vld [vmem:[%s2040_s0 + $0x80] sm:$0xff]  ;;  %v1329_v32 = vld [vmem:[%s2040_s0 + $0x88] sm:$0xff] }
   0x8   :  { %v81_v9 = vadd.f32 %v80_v7, %v1251_v6  ;;  %v1335_v34 = vld [vmem:[%s2040_s0 + $0x90] sm:$0xff]  ;;  %v1341_v36 = vld [vmem:[%s2040_s0 + $0x98] sm:$0xff]  ;;  %v1347_v38 = vld [vmem:[%s2040_s0 + $0xa0] sm:$0xff] }
   0x9   :  { %v1353_v40 = vld [vmem:[%s2040_s0 + $0xa8] sm:$0xff]  ;;  %v1359_v42 = vld [vmem:[%s2040_s0 + $0xb0] sm:$0xff]  ;;  %v1365_v44 = vld [vmem:[%s2040_s0 + $0xb8] sm:$0xff] }
   0xa   :  { %v82_v11 = vadd.f32 %v81_v9, %v1257_v8  ;;  %v1371_v46 = vld [vmem:[%s2040_s0 + $0xc0] sm:$0xff]  ;;  %v1377_v48 = vld [vmem:[%s2040_s0 + $0xc8] sm:$0xff]  ;;  %v1383_v50 = vld [vmem:[%s2040_s0 + $0xd0] sm:$0xff] }
   0xb   :  { %v1389_v52 = vld [vmem:[%s2040_s0 + $0xd8] sm:$0xff]  ;;  %v1395_v54 = vld [vmem:[%s2040_s0 + $0xe0] sm:$0xff]  ;;  %v1401_v56 = vld [vmem:[%s2040_s0 + $0xe8] sm:$0xff] }
   0xc   :  { %v83_v13 = vadd.f32 %v82_v11, %v1263_v10  ;;  %v1407_v58 = vld [vmem:[%s2040_s0 + $0xf0] sm:$0xff]  ;;  %v1413_v60 = vld [vmem:[%s2040_s0 + $0xf8] sm:$0xff]  ;;  %v1419_v62 = vld [vmem:[%s2040_s0 + $0x100] sm:$0xff] }
   0xd   :  { %v1425_v3 = vld [vmem:[%s2040_s0 + $0x108] sm:$0xff]  ;;  %v1431_v7 = vld [vmem:[%s2040_s0 + $0x110] sm:$0xff]  ;;  %v1437_v11 = vld [vmem:[%s2040_s0 + $0x118] sm:$0xff] }
   0xe   :  { %v84_v15 = vadd.f32 %v83_v13, %v1269_v12 }
  0x10   :  { %v85_v17 = vadd.f32 %v84_v15, %v1275_v14  ;;  %v1443_v15 = vld [vmem:[%s2040_s0 + $0x120] sm:$0xff] }
  0x12   :  { %v86_v19 = vadd.f32 %v85_v17, %v1281_v16 }
  0x14   :  { %v87_v21 = vadd.f32 %v86_v19, %v1287_v18  ;;  %v1449_v19 = vld [vmem:[%s2040_s0 + $0x128] sm:$0xff] }
  0x16   :  { %v88_v23 = vadd.f32 %v87_v21, %v1293_v20 }
  0x18   :  { %v89_v25 = vadd.f32 %v88_v23, %v1299_v22  ;;  %v1455_v23 = vld [vmem:[%s2040_s0 + $0x130] sm:$0xff] }
  0x1a   :  { %v90_v27 = vadd.f32 %v89_v25, %v1305_v24 }
  0x1c   :  { %v91_v29 = vadd.f32 %v90_v27, %v1311_v26  ;;  %v1461_v27 = vld [vmem:[%s2040_s0 + $0x138] sm:$0xff] }
  0x1e   :  { %v92_v31 = vadd.f32 %v91_v29, %v1317_v28 }
  0x20   :  { %v93_v33 = vadd.f32 %v92_v31, %v1323_v30  ;;  %v1467_v31 = vld [vmem:[%s2040_s0 + $0x140] sm:$0xff] }
  0x22   :  { %v94_v35 = vadd.f32 %v93_v33, %v1329_v32 }
  0x24   :  { %v95_v37 = vadd.f32 %v94_v35, %v1335_v34  ;;  %v1473_v35 = vld [vmem:[%s2040_s0 + $0x148] sm:$0xff] }
  0x26   :  { %v96_v39 = vadd.f32 %v95_v37, %v1341_v36 }
  0x28   :  { %v97_v41 = vadd.f32 %v96_v39, %v1347_v38  ;;  %v1479_v39 = vld [vmem:[%s2040_s0 + $0x150] sm:$0xff] }
  0x2a   :  { %v98_v43 = vadd.f32 %v97_v41, %v1353_v40 }
  0x2c   :  { %v99_v45 = vadd.f32 %v98_v43, %v1359_v42  ;;  %v1485_v43 = vld [vmem:[%s2040_s0 + $0x158] sm:$0xff] }
  0x2e   :  { %v100_v47 = vadd.f32 %v99_v45, %v1365_v44 }
  0x30   :  { %v101_v49 = vadd.f32 %v100_v47, %v1371_v46  ;;  %v1491_v47 = vld [vmem:[%s2040_s0 + $0x160] sm:$0xff] }
  0x32   :  { %v102_v51 = vadd.f32 %v101_v49, %v1377_v48 }
  0x34   :  { %v103_v53 = vadd.f32 %v102_v51, %v1383_v50  ;;  %v1497_v51 = vld [vmem:[%s2040_s0 + $0x168] sm:$0xff] }
  0x35   :  { %2088 = vst [vmem:[#allocation8_spill] sm:$0xff] %v1497_v51 }
  0x36   :  { %v104_v55 = vadd.f32 %v103_v53, %v1389_v52 }
  0x38   :  { %v105_v57 = vadd.f32 %v104_v55, %v1395_v54  ;;  %v1503_v55 = vld [vmem:[%s2040_s0 + $0x170] sm:$0xff] }
  0x39   :  { %2089 = vst [vmem:[#allocation9_spill] sm:$0xff] %v1503_v55 }
  0x3a   :  { %v106_v59 = vadd.f32 %v105_v57, %v1401_v56 }
  0x3c   :  { %v107_v61 = vadd.f32 %v106_v59, %v1407_v58  ;;  %v1509_v59 = vld [vmem:[%s2040_s0 + $0x178] sm:$0xff] }
  0x3d   :  { %2090 = vst [vmem:[#allocation10_spill] sm:$0xff] %v1509_v59 }
  0x3e   :  { %v108_v63 = vadd.f32 %v107_v61, %v1413_v60 }
  0x40   :  { %v109_v5 = vadd.f32 %v108_v63, %v1419_v62  ;;  %v1515_v63 = vld [vmem:[%s2040_s0 + $0x180] sm:$0xff] }
  0x41   :  { %2091 = vst [vmem:[#allocation11_spill] sm:$0xff] %v1515_v63 }
  0x42   :  { %v110_v9 = vadd.f32 %v109_v5, %v1425_v3 }
  0x44   :  { %v111_v13 = vadd.f32 %v110_v9, %v1431_v7  ;;  %v1521_v9 = vld [vmem:[%s2040_s0 + $0x188] sm:$0xff] }
  0x45   :  { %2092 = vst [vmem:[#allocation12_spill] sm:$0xff] %v1521_v9 }
  0x46   :  { %v112_v17 = vadd.f32 %v111_v13, %v1437_v11 }
  0x48   :  { %v113_v21 = vadd.f32 %v112_v17, %v1443_v15  ;;  %v1527_v17 = vld [vmem:[%s2040_s0 + $0x190] sm:$0xff] }
  0x49   :  { %2093 = vst [vmem:[#allocation13_spill] sm:$0xff] %v1527_v17 }
  0x4a   :  { %v114_v25 = vadd.f32 %v113_v21, %v1449_v19 }
  0x4c   :  { %v115_v29 = vadd.f32 %v114_v25, %v1455_v23  ;;  %v1533_v25 = vld [vmem:[%s2040_s0 + $0x198] sm:$0xff] }
  0x4d   :  { %2094 = vst [vmem:[#allocation14_spill] sm:$0xff] %v1533_v25 }
  0x4e   :  { %v116_v33 = vadd.f32 %v115_v29, %v1461_v27 }
  0x50   :  { %v117_v37 = vadd.f32 %v116_v33, %v1467_v31  ;;  %v1539_v33 = vld [vmem:[%s2040_s0 + $0x1a0] sm:$0xff] }
  0x51   :  { %2095 = vst [vmem:[#allocation15_spill] sm:$0xff] %v1539_v33 }
  0x52   :  { %v118_v41 = vadd.f32 %v117_v37, %v1473_v35 }
  0x54   :  { %v119_v45 = vadd.f32 %v118_v41, %v1479_v39  ;;  %v1545_v41 = vld [vmem:[%s2040_s0 + $0x1a8] sm:$0xff] }
  0x55   :  { %2096 = vst [vmem:[#allocation16_spill] sm:$0xff] %v1545_v41 }
  0x56   :  { %v120_v49 = vadd.f32 %v119_v45, %v1485_v43 }
  0x58   :  { %v121_v53 = vadd.f32 %v120_v49, %v1491_v47  ;;  %v1551_v49 = vld [vmem:[%s2040_s0 + $0x1b0] sm:$0xff] }
  0x59   :  { %2097 = vst [vmem:[#allocation17_spill] sm:$0xff] %v1551_v49 }
  0x5a   :  { %v122_v57 = vadd.f32 %v121_v53, %v1497_v51 }
  0x5c   :  { %v123_v61 = vadd.f32 %v122_v57, %v1503_v55  ;;  %v1557_v57 = vld [vmem:[%s2040_s0 + $0x1b8] sm:$0xff] }
  0x5d   :  { %2098 = vst [vmem:[#allocation18_spill] sm:$0xff] %v1557_v57 }
  0x5e   :  { %v124_v5 = vadd.f32 %v123_v61, %v1509_v59 }
  0x60   :  { %v125_v13 = vadd.f32 %v124_v5, %v1515_v63  ;;  %v1563_v5 = vld [vmem:[%s2040_s0 + $0x1c0] sm:$0xff] }
  0x61   :  { %2099 = vst [vmem:[#allocation19_spill] sm:$0xff] %v1563_v5 }
  0x62   :  { %v126_v21 = vadd.f32 %v125_v13, %v1521_v9 }
  0x64   :  { %v127_v29 = vadd.f32 %v126_v21, %v1527_v17  ;;  %v1569_v21 = vld [vmem:[%s2040_s0 + $0x1c8] sm:$0xff] }
  0x65   :  { %2100 = vst [vmem:[#allocation20_spill] sm:$0xff] %v1569_v21 }
  0x66   :  { %v128_v37 = vadd.f32 %v127_v29, %v1533_v25 }
  0x68   :  { %v129_v45 = vadd.f32 %v128_v37, %v1539_v33  ;;  %v1575_v37 = vld [vmem:[%s2040_s0 + $0x1d0] sm:$0xff] }
  0x69   :  { %2101 = vst [vmem:[#allocation21_spill] sm:$0xff] %v1575_v37 }
  0x6a   :  { %v130_v53 = vadd.f32 %v129_v45, %v1545_v41 }
  0x6c   :  { %v131_v61 = vadd.f32 %v130_v53, %v1551_v49  ;;  %v1581_v53 = vld [vmem:[%s2040_s0 + $0x1d8] sm:$0xff] }
  0x6d   :  { %2102 = vst [vmem:[#allocation22_spill] sm:$0xff] %v1581_v53 }
  0x6e   :  { %v132_v13 = vadd.f32 %v131_v61, %v1557_v57 }
  0x70   :  { %v133_v29 = vadd.f32 %v132_v13, %v1563_v5  ;;  %v1588_v13 = vld [vmem:[%s2040_s0 + $0x1e0] sm:$0xff] }
  0x71   :  { %2103 = vst [vmem:[#allocation23_spill] sm:$0xff] %v1588_v13 }
  0x72   :  { %v134_v45 = vadd.f32 %v133_v29, %v1569_v21  ;;  %v1594_v29 = vld [vmem:[%s2040_s0 + $0x1e8] sm:$0xff] }
  0x73   :  { %2104 = vst [vmem:[#allocation24_spill] sm:$0xff] %v1594_v29 }
  0x74   :  { %v135_v61 = vadd.f32 %v134_v45, %v1575_v37  ;;  %v1600_v45 = vld [vmem:[%s2040_s0 + $0x1f0] sm:$0xff] }
  0x75   :  { %2105 = vst [vmem:[#allocation25_spill] sm:$0xff] %v1600_v45 }
  0x76   :  { %v136_v57 = vadd.f32 %v135_v61, %v1581_v53  ;;  %v1606_v53 = vld [vmem:[%s2040_s0 + $0x1f8] sm:$0xff] }
  0x77   :  { %2106 = vst [vmem:[#allocation26_spill] sm:$0xff] %v1606_v53 }
  0x78   :  { %v137_v5 = vadd.f32 %v136_v57, %v1588_v13 }
  0x7a   :  { %v138_v21 = vadd.f32 %v137_v5, %v1594_v29 }
  0x7c   :  { %v139_v61 = vadd.f32 %v138_v21, %v1600_v45 }
  0x7e   :  { %v140_v57 = vadd.f32 %v139_v61, %v1606_v53 }
  0x80   :  { %v141_v13 = vrot.slane %v140_v57, 4 }
  0x82   :  { %v142_v37 = vadd.f32 %v141_v13, %v140_v57 }
  0x84   :  { %v143_v49 = vrot.slane %v142_v37, 2 }
  0x86   :  { %v144_v41 = vadd.f32 %v143_v49, %v142_v37 }
  0x88   :  { %v145_v33 = vrot.slane %v144_v41, 1 }
  0x8a   :  { %v146_v5 = vadd.f32 %v145_v33, %v144_v41 }
  0x8c   :  { %v1609_v29 = vmul.f32 0.001953125, %v146_v5 }
  0x8e   :  { %v148_v25 = vsub.f32 %v1228_v0, %v1609_v29  ;;  %v149_v21 = vsub.f32 %v1233_v1, %v1609_v29  ;;  %v150_v45 = vsub.f32 %v1238_v2, %v1609_v29  ;;  %v151_v61 = vsub.f32 %v1245_v4, %v1609_v29 }
  0x8f   :  { %v152_v49 = vsub.f32 %v1251_v6, %v1609_v29  ;;  %v153_v41 = vsub.f32 %v1257_v8, %v1609_v29  ;;  %v154_v5 = vsub.f32 %v1263_v10, %v1609_v29  ;;  %v155_v2 = vsub.f32 %v1269_v12, %v1609_v29 }
  0x90   :  { %v212_v53 = vmul.f32 %v148_v25, %v148_v25  ;;  %v213_v13 = vmul.f32 %v149_v21, %v149_v21  ;;  %v214_v33 = vmul.f32 %v150_v45, %v150_v45  ;;  %v215_v37 = vmul.f32 %v151_v61, %v151_v61 }
  0x91   :  { %v216_v1 = vmul.f32 %v152_v49, %v152_v49  ;;  %v217_v4 = vmul.f32 %v153_v41, %v153_v41  ;;  %v156_v21 = vsub.f32 %v1275_v14, %v1609_v29  ;;  %v218_v6 = vmul.f32 %v154_v5, %v154_v5 }
  0x92   :  { %v276_v57 = vadd.f32 %v213_v13, %v212_v53  ;;  %v157_v8 = vsub.f32 %v1281_v16, %v1609_v29  ;;  %v219_v61 = vmul.f32 %v155_v2, %v155_v2  ;;  %v158_v13 = vsub.f32 %v1287_v18, %v1609_v29 }
  0x93   :  { %v220_v49 = vmul.f32 %v156_v21, %v156_v21 }
  0x94   :  { %v277_v0 = vadd.f32 %v276_v57, %v214_v33  ;;  %v159_v57 = vsub.f32 %v1293_v20, %v1609_v29  ;;  %v221_v41 = vmul.f32 %v157_v8, %v157_v8  ;;  %v222_v5 = vmul.f32 %v158_v13, %v158_v13 }
  0x96   :  { %v278_v25 = vadd.f32 %v277_v0, %v215_v37  ;;  %v160_v37 = vsub.f32 %v1299_v22, %v1609_v29  ;;  %v223_v2 = vmul.f32 %v159_v57, %v159_v57 }
  0x98   :  { %v279_v45 = vadd.f32 %v278_v25, %v216_v1  ;;  %v161_v25 = vsub.f32 %v1305_v24, %v1609_v29  ;;  %v224_v21 = vmul.f32 %v160_v37, %v160_v37 }
  0x9a   :  { %v280_v53 = vadd.f32 %v279_v45, %v217_v4  ;;  %v162_v45 = vsub.f32 %v1311_v26, %v1609_v29  ;;  %v225_v8 = vmul.f32 %v161_v25, %v161_v25 }
  0x9c   :  { %v281_v33 = vadd.f32 %v280_v53, %v218_v6  ;;  %v163_v53 = vsub.f32 %v1317_v28, %v1609_v29  ;;  %v226_v13 = vmul.f32 %v162_v45, %v162_v45 }
  0x9e   :  { %v282_v0 = vadd.f32 %v281_v33, %v219_v61  ;;  %v164_v33 = vsub.f32 %v1323_v30, %v1609_v29  ;;  %v227_v57 = vmul.f32 %v163_v53, %v163_v53 }
  0xa0   :  { %v283_v1 = vadd.f32 %v282_v0, %v220_v49  ;;  %v165_v0 = vsub.f32 %v1329_v32, %v1609_v29  ;;  %v228_v37 = vmul.f32 %v164_v33, %v164_v33 }
  0xa2   :  { %v284_v4 = vadd.f32 %v283_v1, %v221_v41  ;;  %v166_v1 = vsub.f32 %v1335_v34, %v1609_v29  ;;  %v229_v25 = vmul.f32 %v165_v0, %v165_v0 }
  0xa4   :  { %v285_v6 = vadd.f32 %v284_v4, %v222_v5  ;;  %v167_v4 = vsub.f32 %v1341_v36, %v1609_v29  ;;  %v230_v45 = vmul.f32 %v166_v1, %v166_v1 }
  0xa6   :  { %v286_v61 = vadd.f32 %v285_v6, %v223_v2  ;;  %v168_v6 = vsub.f32 %v1347_v38, %v1609_v29  ;;  %v231_v53 = vmul.f32 %v167_v4, %v167_v4 }
  0xa8   :  { %v287_v49 = vadd.f32 %v286_v61, %v224_v21  ;;  %v169_v61 = vsub.f32 %v1353_v40, %v1609_v29  ;;  %v232_v33 = vmul.f32 %v168_v6, %v168_v6 }
  0xaa   :  { %v288_v41 = vadd.f32 %v287_v49, %v225_v8  ;;  %v170_v49 = vsub.f32 %v1359_v42, %v1609_v29  ;;  %v233_v0 = vmul.f32 %v169_v61, %v169_v61 }
  0xac   :  { %v289_v5 = vadd.f32 %v288_v41, %v226_v13  ;;  %v171_v41 = vsub.f32 %v1365_v44, %v1609_v29  ;;  %v234_v1 = vmul.f32 %v170_v49, %v170_v49 }
  0xae   :  { %v290_v2 = vadd.f32 %v289_v5, %v227_v57  ;;  %v172_v5 = vsub.f32 %v1371_v46, %v1609_v29  ;;  %v235_v4 = vmul.f32 %v171_v41, %v171_v41 }
  0xb0   :  { %v291_v21 = vadd.f32 %v290_v2, %v228_v37  ;;  %v173_v2 = vsub.f32 %v1377_v48, %v1609_v29  ;;  %v236_v6 = vmul.f32 %v172_v5, %v172_v5 }
  0xb2   :  { %v292_v8 = vadd.f32 %v291_v21, %v229_v25  ;;  %v174_v21 = vsub.f32 %v1383_v50, %v1609_v29  ;;  %v237_v61 = vmul.f32 %v173_v2, %v173_v2 }
  0xb4   :  { %v293_v13 = vadd.f32 %v292_v8, %v230_v45  ;;  %v175_v8 = vsub.f32 %v1389_v52, %v1609_v29  ;;  %v238_v49 = vmul.f32 %v174_v21, %v174_v21 }
  0xb6   :  { %v294_v57 = vadd.f32 %v293_v13, %v231_v53  ;;  %v176_v13 = vsub.f32 %v1395_v54, %v1609_v29  ;;  %v239_v41 = vmul.f32 %v175_v8, %v175_v8 }
  0xb8   :  { %v295_v37 = vadd.f32 %v294_v57, %v232_v33  ;;  %v177_v57 = vsub.f32 %v1401_v56, %v1609_v29  ;;  %v240_v5 = vmul.f32 %v176_v13, %v176_v13 }
  0xba   :  { %v296_v25 = vadd.f32 %v295_v37, %v233_v0  ;;  %v178_v37 = vsub.f32 %v1407_v58, %v1609_v29  ;;  %v241_v2 = vmul.f32 %v177_v57, %v177_v57 }
  0xbc   :  { %v297_v45 = vadd.f32 %v296_v25, %v234_v1  ;;  %v179_v25 = vsub.f32 %v1413_v60, %v1609_v29  ;;  %v242_v21 = vmul.f32 %v178_v37, %v178_v37 }
  0xbe   :  { %v298_v53 = vadd.f32 %v297_v45, %v235_v4  ;;  %v180_v45 = vsub.f32 %v1419_v62, %v1609_v29  ;;  %v243_v8 = vmul.f32 %v179_v25, %v179_v25 }
  0xc0   :  { %v299_v33 = vadd.f32 %v298_v53, %v236_v6  ;;  %v181_v53 = vsub.f32 %v1425_v3, %v1609_v29  ;;  %v244_v13 = vmul.f32 %v180_v45, %v180_v45 }
  0xc2   :  { %v300_v0 = vadd.f32 %v299_v33, %v237_v61  ;;  %v182_v33 = vsub.f32 %v1431_v7, %v1609_v29  ;;  %v245_v57 = vmul.f32 %v181_v53, %v181_v53 }
  0xc4   :  { %v301_v1 = vadd.f32 %v300_v0, %v238_v49  ;;  %v183_v0 = vsub.f32 %v1437_v11, %v1609_v29  ;;  %v246_v37 = vmul.f32 %v182_v33, %v182_v33 }
  0xc6   :  { %v302_v4 = vadd.f32 %v301_v1, %v239_v41  ;;  %v184_v1 = vsub.f32 %v1443_v15, %v1609_v29  ;;  %v247_v25 = vmul.f32 %v183_v0, %v183_v0 }
  0xc8   :  { %v303_v6 = vadd.f32 %v302_v4, %v240_v5  ;;  %v185_v4 = vsub.f32 %v1449_v19, %v1609_v29  ;;  %v248_v45 = vmul.f32 %v184_v1, %v184_v1 }
  0xca   :  { %v304_v61 = vadd.f32 %v303_v6, %v241_v2  ;;  %v186_v6 = vsub.f32 %v1455_v23, %v1609_v29  ;;  %v249_v53 = vmul.f32 %v185_v4, %v185_v4 }
  0xcc   :  { %v305_v49 = vadd.f32 %v304_v61, %v242_v21  ;;  %v187_v61 = vsub.f32 %v1461_v27, %v1609_v29  ;;  %v250_v33 = vmul.f32 %v186_v6, %v186_v6 }
  0xce   :  { %v306_v41 = vadd.f32 %v305_v49, %v243_v8  ;;  %v188_v49 = vsub.f32 %v1467_v31, %v1609_v29  ;;  %v251_v0 = vmul.f32 %v187_v61, %v187_v61 }
  0xd0   :  { %v307_v5 = vadd.f32 %v306_v41, %v244_v13  ;;  %v189_v41 = vsub.f32 %v1473_v35, %v1609_v29  ;;  %v252_v1 = vmul.f32 %v188_v49, %v188_v49 }
  0xd2   :  { %v308_v2 = vadd.f32 %v307_v5, %v245_v57  ;;  %v190_v5 = vsub.f32 %v1479_v39, %v1609_v29  ;;  %v253_v4 = vmul.f32 %v189_v41, %v189_v41 }
  0xd4   :  { %v309_v21 = vadd.f32 %v308_v2, %v246_v37  ;;  %v191_v2 = vsub.f32 %v1485_v43, %v1609_v29  ;;  %v254_v6 = vmul.f32 %v190_v5, %v190_v5 }
  0xd6   :  { %v310_v8 = vadd.f32 %v309_v21, %v247_v25  ;;  %v192_v21 = vsub.f32 %v1491_v47, %v1609_v29  ;;  %v255_v61 = vmul.f32 %v191_v2, %v191_v2 }
  0xd8   :  { %v311_v13 = vadd.f32 %v310_v8, %v248_v45  ;;  %v193_v8 = vsub.f32 %v1497_v51, %v1609_v29  ;;  %v256_v49 = vmul.f32 %v192_v21, %v192_v21 }
  0xda   :  { %v312_v57 = vadd.f32 %v311_v13, %v249_v53  ;;  %v194_v13 = vsub.f32 %v1503_v55, %v1609_v29  ;;  %v257_v41 = vmul.f32 %v193_v8, %v193_v8 }
  0xdc   :  { %v313_v37 = vadd.f32 %v312_v57, %v250_v33  ;;  %v195_v57 = vsub.f32 %v1509_v59, %v1609_v29  ;;  %v258_v5 = vmul.f32 %v194_v13, %v194_v13 }
  0xde   :  { %v314_v25 = vadd.f32 %v313_v37, %v251_v0  ;;  %v196_v37 = vsub.f32 %v1515_v63, %v1609_v29  ;;  %v259_v2 = vmul.f32 %v195_v57, %v195_v57 }
  0xe0   :  { %v315_v45 = vadd.f32 %v314_v25, %v252_v1  ;;  %v197_v25 = vsub.f32 %v1521_v9, %v1609_v29  ;;  %v260_v21 = vmul.f32 %v196_v37, %v196_v37 }
  0xe2   :  { %v316_v53 = vadd.f32 %v315_v45, %v253_v4  ;;  %v198_v45 = vsub.f32 %v1527_v17, %v1609_v29  ;;  %v261_v8 = vmul.f32 %v197_v25, %v197_v25 }
  0xe4   :  { %v317_v33 = vadd.f32 %v316_v53, %v254_v6  ;;  %v2107_v53 = vld [vmem:[#allocation14_spill] sm:$0xff]  ;;  %v262_v13 = vmul.f32 %v198_v45, %v198_v45 }
  0xe5   :  { %v199_v59 = vsub.f32 %v2107_v53, %v1609_v29 }
  0xe6   :  { %v318_v0 = vadd.f32 %v317_v33, %v255_v61  ;;  %v2108_v33 = vld [vmem:[#allocation15_spill] sm:$0xff] }
  0xe7   :  { %v200_v63 = vsub.f32 %v2108_v33, %v1609_v29  ;;  %v263_v57 = vmul.f32 %v199_v59, %v199_v59 }
  0xe8   :  { %v319_v1 = vadd.f32 %v318_v0, %v256_v49  ;;  %v2109_v0 = vld [vmem:[#allocation16_spill] sm:$0xff] }
  0xe9   :  { %v201_v9 = vsub.f32 %v2109_v0, %v1609_v29  ;;  %v264_v37 = vmul.f32 %v200_v63, %v200_v63 }
  0xea   :  { %v320_v4 = vadd.f32 %v319_v1, %v257_v41  ;;  %v2110_v1 = vld [vmem:[#allocation17_spill] sm:$0xff] }
  0xeb   :  { %v202_v17 = vsub.f32 %v2110_v1, %v1609_v29  ;;  %v265_v25 = vmul.f32 %v201_v9, %v201_v9 }
  0xec   :  { %v321_v6 = vadd.f32 %v320_v4, %v258_v5  ;;  %v2111_v4 = vld [vmem:[#allocation18_spill] sm:$0xff] }
  0xed   :  { %v203_v53 = vsub.f32 %v2111_v4, %v1609_v29  ;;  %v266_v45 = vmul.f32 %v202_v17, %v202_v17 }
  0xee   :  { %v322_v61 = vadd.f32 %v321_v6, %v259_v2  ;;  %v2112_v6 = vld [vmem:[#allocation19_spill] sm:$0xff] }
  0xef   :  { %v204_v33 = vsub.f32 %v2112_v6, %v1609_v29  ;;  %v267_v59 = vmul.f32 %v203_v53, %v203_v53 }
  0xf0   :  { %v323_v49 = vadd.f32 %v322_v61, %v260_v21  ;;  %v2113_v61 = vld [vmem:[#allocation20_spill] sm:$0xff] }
  0xf1   :  { %v205_v0 = vsub.f32 %v2113_v61, %v1609_v29  ;;  %v268_v63 = vmul.f32 %v204_v33, %v204_v33 }
  0xf2   :  { %v324_v41 = vadd.f32 %v323_v49, %v261_v8  ;;  %v2114_v49 = vld [vmem:[#allocation21_spill] sm:$0xff] }
  0xf3   :  { %v206_v1 = vsub.f32 %v2114_v49, %v1609_v29  ;;  %v269_v9 = vmul.f32 %v205_v0, %v205_v0 }
  0xf4   :  { %v325_v5 = vadd.f32 %v324_v41, %v262_v13  ;;  %v2115_v41 = vld [vmem:[#allocation22_spill] sm:$0xff] }
  0xf5   :  { %v207_v4 = vsub.f32 %v2115_v41, %v1609_v29  ;;  %v270_v17 = vmul.f32 %v206_v1, %v206_v1 }
  0xf6   :  { %v326_v2 = vadd.f32 %v325_v5, %v263_v57  ;;  %v2116_v5 = vld [vmem:[#allocation23_spill] sm:$0xff] }
  0xf7   :  { %v208_v6 = vsub.f32 %v2116_v5, %v1609_v29  ;;  %v271_v53 = vmul.f32 %v207_v4, %v207_v4 }
  0xf8   :  { %v327_v21 = vadd.f32 %v326_v2, %v264_v37  ;;  %v2117_v2 = vld [vmem:[#allocation24_spill] sm:$0xff] }
  0xf9   :  { %v209_v61 = vsub.f32 %v2117_v2, %v1609_v29  ;;  %v272_v33 = vmul.f32 %v208_v6, %v208_v6 }
  0xfa   :  { %v328_v8 = vadd.f32 %v327_v21, %v265_v25  ;;  %v2118_v21 = vld [vmem:[#allocation25_spill] sm:$0xff] }
  0xfb   :  { %v210_v49 = vsub.f32 %v2118_v21, %v1609_v29  ;;  %v273_v0 = vmul.f32 %v209_v61, %v209_v61 }
  0xfc   :  { %v329_v13 = vadd.f32 %v328_v8, %v266_v45  ;;  %v2119_v8 = vld [vmem:[#allocation26_spill] sm:$0xff] }
  0xfd   :  { %v211_v41 = vsub.f32 %v2119_v8, %v1609_v29 }
  0xfe   :  { %v330_v57 = vadd.f32 %v329_v13, %v267_v59  ;;  %v274_v13 = vmul.f32 %v210_v49, %v210_v49  ;;  %v357_v49 = vlaneseq }
  0xff   :  { %v275_v5 = vmul.f32 %v211_v41, %v211_v41 }
 0x100   :  { %v331_v37 = vadd.f32 %v330_v57, %v268_v63 }
 0x102   :  { %v332_v25 = vadd.f32 %v331_v37, %v269_v9  ;;  %v345_v9 = vmul.f32 0.0, %v1609_v29 }
 0x104   :  { %v333_v45 = vadd.f32 %v332_v25, %v270_v17  ;;  %v346_v6 = vmul.f32 %v345_v9, %v1609_v29  ;;  %v2124_v9 = vld [vmem:[#allocation6_spill] sm:$0xff] }
 0x106   :  { %v334_v59 = vadd.f32 %v333_v45, %v271_v53  ;;  %v358_v53 = vshrl.u32 %v357_v49, 7 }
 0x108   :  { %v335_v55 = vadd.f32 %v334_v59, %v272_v33  ;;  %v359_v41 = vsub.s32 0, %v358_v53  ;;  %v2121_v59 = vld [vmem:[#allocation3_spill] sm:$0xff] }
 0x10a   :  { %v336_v1 = vadd.f32 %v335_v55, %v273_v0  ;;  %v351_v55 = vld [vmem:[%s2041_s1] sm:$0x1] }
 0x10c   :  { %v337_v63 = vadd.f32 %v336_v1, %v274_v13  ;;  %v2122_v1 = vld [vmem:[#allocation4_spill] sm:$0xff] }
 0x10e   :  { %v338_v57 = vadd.f32 %v337_v63, %v275_v5 }
 0x110   :  { %v339_v51 = vrot.slane %v338_v57, 4 }
 0x112   :  { %v340_v2 = vadd.f32 %v339_v51, %v338_v57  ;;  %v2123_v57 = vld [vmem:[#allocation5_spill] sm:$0xff] }
 0x114   :  { %v341_v4 = vrot.slane %v340_v2, 2 }
 0x116   :  { %v342_v37 = vadd.f32 %v341_v4, %v340_v2  ;;  %v353_v2 = vld [vmem:[%s2042_s2] sm:$0x1] }
 0x118   :  { %v343_v21 = vrot.slane %v342_v37, 1 }
 0x11a   :  { %v344_v17 = vadd.f32 %v343_v21, %v342_v37 }
 0x11c   :  { %v347_v25 = vsub.f32 %v344_v17, %v346_v6  ;;  %v2125_v6 = vld [vmem:[#allocation7_spill] sm:$0xff] }
 0x11e   :  { %v348_v8 = vmul.f32 0.001953125, %v347_v25 }
 0x120   :  { %v349_v61 = vadd.f32 1e-05, %v348_v8  ;;  %v2120_v8 = vld [vmem:[#allocation2_spill] sm:$0xff] }
 0x122   :  { %1203 = vrsqrt.f32 %v349_v61 }
 0x12f   :  { %v1204_v51 = vpop.eup %1203 }
 0x130   :  { %v352_v5 = vmul.f32 %v1204_v51, %v351_v55 }
 0x132   :  { %v354_v33 = vmul.f32 %v352_v5, %v1609_v29  ;;  %v1748_v21 = vrot.slane %v352_v5, %v359_v41 }
 0x134   :  { %v355_v45 = vsub.f32 %v353_v2, %v354_v33  ;;  %v362_v0 = vmul.f32 %v1748_v21, %v2120_v8  ;;  %v363_v13 = vmul.f32 %v1748_v21, %v2121_v59  ;;  %v364_v63 = vmul.f32 %v1748_v21, %v2122_v1 }
 0x135   :  { %v365_v4 = vmul.f32 %v1748_v21, %v2123_v57  ;;  %v366_v37 = vmul.f32 %v1748_v21, %v2124_v9  ;;  %v367_v29 = vmul.f32 %v1748_v21, %v2125_v6  ;;  %v368_v17 = vmul.f32 %v1748_v21, %v1263_v10 }
 0x136   :  { %v1764_v25 = vrot.slane %v355_v45, %v359_v41  ;;  %v369_v61 = vmul.f32 %v1748_v21, %v1269_v12  ;;  %v370_v49 = vmul.f32 %v1748_v21, %v1275_v14  ;;  %v371_v53 = vmul.f32 %v1748_v21, %v1281_v16 }
 0x137   :  { %v372_v55 = vmul.f32 %v1748_v21, %v1287_v18  ;;  %v373_v51 = vmul.f32 %v1748_v21, %v1293_v20  ;;  %v374_v10 = vmul.f32 %v1748_v21, %v1299_v22  ;;  %v375_v41 = vmul.f32 %v1748_v21, %v1305_v24 }
 0x138   :  { %v432_v12 = vadd.f32 %v1764_v25, %v362_v0  ;;  %v433_v5 = vadd.f32 %v1764_v25, %v363_v13  ;;  %v434_v14 = vadd.f32 %v1764_v25, %v364_v63  ;;  %v435_v16 = vadd.f32 %v1764_v25, %v365_v4 }
 0x139   :  { %v436_v2 = vadd.f32 %v1764_v25, %v366_v37  ;;  %v437_v18 = vadd.f32 %v1764_v25, %v367_v29  ;;  %v438_v20 = vadd.f32 %v1764_v25, %v368_v17  ;;  %v439_v33 = vadd.f32 %v1764_v25, %v369_v61 }
 0x13a   :  { %v496_v22 = vmax.f32 %v432_v12, 0.0  ;;  %v497_v45 = vmax.f32 %v433_v5, 0.0  ;;  %v498_v8 = vmax.f32 %v434_v14, 0.0  ;;  %v499_v24 = vmax.f32 %v435_v16, 0.0 }
 0x13b   :  { %v500_v59 = vmax.f32 %v436_v2, 0.0  ;;  %v501_v0 = vmax.f32 %v437_v18, 0.0  ;;  %v502_v1 = vmax.f32 %v438_v20, 0.0  ;;  %v503_v13 = vmax.f32 %v439_v33, 0.0 }
 0x13c   :  { %v1015_v57 = vpack.c.bf16 %v497_v45, %v496_v22  ;;  %v1020_v63 = vpack.c.bf16 %v499_v24, %v498_v8  ;;  %v440_v4 = vadd.f32 %v1764_v25, %v370_v49  ;;  %v441_v9 = vadd.f32 %v1764_v25, %v371_v53 }
 0x13d   :  { %v1025_v37 = vpack.c.bf16 %v501_v0, %v500_v59  ;;  %v1030_v6 = vpack.c.bf16 %v503_v13, %v502_v1  ;;  %v442_v29 = vadd.f32 %v1764_v25, %v372_v55  ;;  %v443_v17 = vadd.f32 %v1764_v25, %v373_v51 }
 0x13e   :  { %1016 = vst [vmem:[%s2043_s3] sm:$0xff] %v1015_v57   ;;  %1172 = vst [vmem:[%s2043_s3 + $0x8] sm:$0xff] %v1020_v63   ;;  %v504_v61 = vmax.f32 %v440_v4, 0.0  ;;  %v505_v12 = vmax.f32 %v441_v9, 0.0  ;;  %v444_v49 = vadd.f32 %v1764_v25, %v374_v10  ;;  %v445_v53 = vadd.f32 %v1764_v25, %v375_v41 }
 0x13f   :  { %1173 = vst [vmem:[%s2043_s3 + $0x10] sm:$0xff] %v1025_v37   ;;  %1174 = vst [vmem:[%s2043_s3 + $0x18] sm:$0xff] %v1030_v6   ;;  %v506_v55 = vmax.f32 %v442_v29, 0.0  ;;  %v507_v51 = vmax.f32 %v443_v17, 0.0  ;;  %v376_v5 = vmul.f32 %v1748_v21, %v1311_v26  ;;  %v377_v14 = vmul.f32 %v1748_v21, %v1317_v28 }
 0x140   :  { %v1035_v16 = vpack.c.bf16 %v505_v12, %v504_v61  ;;  %v508_v10 = vmax.f32 %v444_v49, 0.0  ;;  %v509_v2 = vmax.f32 %v445_v53, 0.0  ;;  %v378_v41 = vmul.f32 %v1748_v21, %v1323_v30 }
 0x141   :  { %v1040_v18 = vpack.c.bf16 %v507_v51, %v506_v55  ;;  %v446_v20 = vadd.f32 %v1764_v25, %v376_v5  ;;  %v447_v33 = vadd.f32 %v1764_v25, %v377_v14  ;;  %v379_v22 = vmul.f32 %v1748_v21, %v1329_v32 }
 0x142   :  { %1175 = vst [vmem:[%s2043_s3 + $0x20] sm:$0xff] %v1035_v16   ;;  %v1045_v26 = vpack.c.bf16 %v509_v2, %v508_v10  ;;  %v448_v28 = vadd.f32 %v1764_v25, %v378_v41  ;;  %v380_v45 = vmul.f32 %v1748_v21, %v1335_v34  ;;  %v381_v30 = vmul.f32 %v1748_v21, %v1341_v36 }
 0x143   :  { %1176 = vst [vmem:[%s2043_s3 + $0x28] sm:$0xff] %v1040_v18   ;;  %v510_v8 = vmax.f32 %v446_v20, 0.0  ;;  %v511_v24 = vmax.f32 %v447_v33, 0.0  ;;  %v449_v32 = vadd.f32 %v1764_v25, %v379_v22  ;;  %v382_v59 = vmul.f32 %v1748_v21, %v1347_v38 }
 0x144   :  { %1177 = vst [vmem:[%s2043_s3 + $0x30] sm:$0xff] %v1045_v26   ;;  %v512_v0 = vmax.f32 %v448_v28, 0.0  ;;  %v450_v34 = vadd.f32 %v1764_v25, %v380_v45  ;;  %v451_v36 = vadd.f32 %v1764_v25, %v381_v30  ;;  %v383_v1 = vmul.f32 %v1748_v21, %v1353_v40 }
 0x145   :  { %v1050_v13 = vpack.c.bf16 %v511_v24, %v510_v8  ;;  %v513_v57 = vmax.f32 %v449_v32, 0.0  ;;  %v452_v63 = vadd.f32 %v1764_v25, %v382_v59  ;;  %v384_v4 = vmul.f32 %v1748_v21, %v1359_v42 }
 0x146   :  { %v514_v38 = vmax.f32 %v450_v34, 0.0  ;;  %v515_v9 = vmax.f32 %v451_v36, 0.0  ;;  %v453_v37 = vadd.f32 %v1764_v25, %v383_v1  ;;  %v385_v6 = vmul.f32 %v1748_v21, %v1365_v44 }
 0x147   :  { %1178 = vst [vmem:[%s2043_s3 + $0x38] sm:$0xff] %v1050_v13   ;;  %v1055_v29 = vpack.c.bf16 %v513_v57, %v512_v0  ;;  %v516_v40 = vmax.f32 %v452_v63, 0.0  ;;  %v454_v17 = vadd.f32 %v1764_v25, %v384_v4  ;;  %v386_v61 = vmul.f32 %v1748_v21, %v1371_v46 }
 0x148   :  { %v1060_v12 = vpack.c.bf16 %v515_v9, %v514_v38  ;;  %v517_v42 = vmax.f32 %v453_v37, 0.0  ;;  %v455_v49 = vadd.f32 %v1764_v25, %v385_v6  ;;  %v387_v53 = vmul.f32 %v1748_v21, %v1377_v48 }
 0x149   :  { %1179 = vst [vmem:[%s2043_s3 + $0x40] sm:$0xff] %v1055_v29   ;;  %v518_v44 = vmax.f32 %v454_v17, 0.0  ;;  %v456_v55 = vadd.f32 %v1764_v25, %v386_v61  ;;  %v388_v51 = vmul.f32 %v1748_v21, %v1383_v50  ;;  %v389_v46 = vmul.f32 %v1748_v21, %v1389_v52 }
 0x14a   :  { %1180 = vst [vmem:[%s2043_s3 + $0x48] sm:$0xff] %v1060_v12   ;;  %v1065_v5 = vpack.c.bf16 %v517_v42, %v516_v40  ;;  %v519_v14 = vmax.f32 %v455_v49, 0.0  ;;  %v457_v48 = vadd.f32 %v1764_v25, %v387_v53  ;;  %v390_v16 = vmul.f32 %v1748_v21, %v1395_v54 }
 0x14b   :  { %v520_v10 = vmax.f32 %v456_v55, 0.0  ;;  %v458_v2 = vadd.f32 %v1764_v25, %v388_v51  ;;  %v459_v41 = vadd.f32 %v1764_v25, %v389_v46  ;;  %v391_v50 = vmul.f32 %v1748_v21, %v1401_v56 }
 0x14c   :  { %1181 = vst [vmem:[%s2043_s3 + $0x50] sm:$0xff] %v1065_v5   ;;  %v1070_v52 = vpack.c.bf16 %v519_v14, %v518_v44  ;;  %v521_v18 = vmax.f32 %v457_v48, 0.0  ;;  %v460_v20 = vadd.f32 %v1764_v25, %v390_v16  ;;  %v392_v33 = vmul.f32 %v1748_v21, %v1407_v58 }
 0x14d   :  { %v522_v54 = vmax.f32 %v458_v2, 0.0  ;;  %v523_v22 = vmax.f32 %v459_v41, 0.0  ;;  %v461_v26 = vadd.f32 %v1764_v25, %v391_v50  ;;  %v393_v28 = vmul.f32 %v1748_v21, %v1413_v60  ;;  %v2127_v50 = vld [vmem:[#allocation9_spill] sm:$0xff] }
 0x14e   :  { %1182 = vst [vmem:[%s2043_s3 + $0x58] sm:$0xff] %v1070_v52   ;;  %v1075_v56 = vpack.c.bf16 %v521_v18, %v520_v10  ;;  %v524_v45 = vmax.f32 %v460_v20, 0.0  ;;  %v462_v30 = vadd.f32 %v1764_v25, %v392_v33  ;;  %v394_v8 = vmul.f32 %v1748_v21, %v1419_v62  ;;  %v2128_v33 = vld [vmem:[#allocation10_spill] sm:$0xff] }
 0x14f   :  { %v1080_v24 = vpack.c.bf16 %v523_v22, %v522_v54  ;;  %v525_v58 = vmax.f32 %v461_v26, 0.0  ;;  %v463_v32 = vadd.f32 %v1764_v25, %v393_v28  ;;  %v395_v59 = vmul.f32 %v1748_v21, %v1425_v3 }
 0x150   :  { %1183 = vst [vmem:[%s2043_s3 + $0x60] sm:$0xff] %v1075_v56   ;;  %v526_v60 = vmax.f32 %v462_v30, 0.0  ;;  %v464_v0 = vadd.f32 %v1764_v25, %v394_v8  ;;  %v396_v34 = vmul.f32 %v1748_v21, %v1431_v7  ;;  %v397_v62 = vmul.f32 %v1748_v21, %v1437_v11  ;;  %v2129_v56 = vld [vmem:[#allocation11_spill] sm:$0xff] }
 0x151   :  { %1184 = vst [vmem:[%s2043_s3 + $0x68] sm:$0xff] %v1080_v24   ;;  %v1085_v36 = vpack.c.bf16 %v525_v58, %v524_v45  ;;  %v527_v1 = vmax.f32 %v463_v32, 0.0  ;;  %v465_v3 = vadd.f32 %v1764_v25, %v395_v59  ;;  %v398_v13 = vmul.f32 %v1748_v21, %v1443_v15  ;;  %v2130_v58 = vld [vmem:[#allocation12_spill] sm:$0xff] }
 0x152   :  { %v528_v57 = vmax.f32 %v464_v0, 0.0  ;;  %v466_v63 = vadd.f32 %v1764_v25, %v396_v34  ;;  %v467_v4 = vadd.f32 %v1764_v25, %v397_v62  ;;  %v399_v7 = vmul.f32 %v1748_v21, %v1449_v19  ;;  %v2131_v0 = vld [vmem:[#allocation13_spill] sm:$0xff]  ;;  %v2132_v62 = vld [vmem:[#allocation14_spill] sm:$0xff] }
 0x153   :  { %1185 = vst [vmem:[%s2043_s3 + $0x70] sm:$0xff] %v1085_v36   ;;  %v1090_v11 = vpack.c.bf16 %v527_v1, %v526_v60  ;;  %v529_v38 = vmax.f32 %v465_v3, 0.0  ;;  %v468_v9 = vadd.f32 %v1764_v25, %v398_v13  ;;  %v400_v37 = vmul.f32 %v1748_v21, %v1455_v23 }
 0x154   :  { %v530_v15 = vmax.f32 %v466_v63, 0.0  ;;  %v531_v6 = vmax.f32 %v467_v4, 0.0  ;;  %v469_v29 = vadd.f32 %v1764_v25, %v399_v7  ;;  %v401_v40 = vmul.f32 %v1748_v21, %v1461_v27 }
 0x155   :  { %1186 = vst [vmem:[%s2043_s3 + $0x78] sm:$0xff] %v1090_v11   ;;  %v1095_v19 = vpack.c.bf16 %v529_v38, %v528_v57  ;;  %v532_v17 = vmax.f32 %v468_v9, 0.0  ;;  %v470_v61 = vadd.f32 %v1764_v25, %v400_v37  ;;  %v402_v12 = vmul.f32 %v1748_v21, %v1467_v31  ;;  %v2133_v57 = vld [vmem:[#allocation15_spill] sm:$0xff]  ;;  %v2134_v38 = vld [vmem:[#allocation16_spill] sm:$0xff] }
 0x156   :  { %v1100_v42 = vpack.c.bf16 %v531_v6, %v530_v15  ;;  %v533_v23 = vmax.f32 %v469_v29, 0.0  ;;  %v471_v49 = vadd.f32 %v1764_v25, %v401_v40  ;;  %v403_v53 = vmul.f32 %v1748_v21, %v1473_v35  ;;  %v2135_v29 = vld [vmem:[#allocation17_spill] sm:$0xff] }
 0x157   :  { %1187 = vst [vmem:[%s2043_s3 + $0x80] sm:$0xff] %v1095_v19   ;;  %v534_v27 = vmax.f32 %v470_v61, 0.0  ;;  %v472_v44 = vadd.f32 %v1764_v25, %v402_v12  ;;  %v404_v55 = vmul.f32 %v1748_v21, %v1479_v39  ;;  %v405_v31 = vmul.f32 %v1748_v21, %v1485_v43  ;;  %v2126_v39 = vld [vmem:[#allocation8_spill] sm:$0xff]  ;;  %v2136_v12 = vld [vmem:[#allocation18_spill] sm:$0xff] }
 0x158   :  { %1188 = vst [vmem:[%s2043_s3 + $0x88] sm:$0xff] %v1100_v42   ;;  %v1105_v51 = vpack.c.bf16 %v533_v23, %v532_v17  ;;  %v535_v46 = vmax.f32 %v471_v49, 0.0  ;;  %v473_v35 = vadd.f32 %v1764_v25, %v403_v53  ;;  %v406_v5 = vmul.f32 %v1748_v21, %v1491_v47 }
 0x159   :  { %v536_v14 = vmax.f32 %v472_v44, 0.0  ;;  %v474_v48 = vadd.f32 %v1764_v25, %v404_v55  ;;  %v475_v16 = vadd.f32 %v1764_v25, %v405_v31  ;;  %v407_v10 = vmul.f32 %v1748_v21, %v2126_v39  ;;  %v2140_v39 = vld [vmem:[#allocation22_spill] sm:$0xff] }
 0x15a   :  { %1189 = vst [vmem:[%s2043_s3 + $0x90] sm:$0xff] %v1105_v51   ;;  %v1110_v43 = vpack.c.bf16 %v535_v46, %v534_v27  ;;  %v537_v2 = vmax.f32 %v473_v35, 0.0  ;;  %v476_v41 = vadd.f32 %v1764_v25, %v406_v5  ;;  %v408_v52 = vmul.f32 %v1748_v21, %v2127_v50  ;;  %v2137_v27 = vld [vmem:[#allocation19_spill] sm:$0xff]  ;;  %v2138_v46 = vld [vmem:[#allocation20_spill] sm:$0xff] }
 0x15b   :  { %v538_v47 = vmax.f32 %v474_v48, 0.0  ;;  %v539_v18 = vmax.f32 %v475_v16, 0.0  ;;  %v477_v20 = vadd.f32 %v1764_v25, %v407_v10  ;;  %v409_v54 = vmul.f32 %v1748_v21, %v2128_v33  ;;  %v2139_v48 = vld [vmem:[#allocation21_spill] sm:$0xff]  ;;  %v2141_v50 = vld [vmem:[#allocation23_spill] sm:$0xff]  ;;  %v2142_v33 = vld [vmem:[#allocation24_spill] sm:$0xff] }
 0x15c   :  { %1190 = vst [vmem:[%s2043_s3 + $0x98] sm:$0xff] %v1110_v43   ;;  %v1115_v22 = vpack.c.bf16 %v537_v2, %v536_v14  ;;  %v540_v26 = vmax.f32 %v476_v41, 0.0  ;;  %v478_v28 = vadd.f32 %v1764_v25, %v408_v52  ;;  %v410_v45 = vmul.f32 %v1748_v21, %v2129_v56  ;;  %v2143_v56 = vld [vmem:[#allocation25_spill] sm:$0xff] }
 0x15d   :  { %v1120_v30 = vpack.c.bf16 %v539_v18, %v538_v47  ;;  %v541_v8 = vmax.f32 %v477_v20, 0.0  ;;  %v479_v24 = vadd.f32 %v1764_v25, %v409_v54  ;;  %v411_v32 = vmul.f32 %v1748_v21, %v2130_v58  ;;  %v2144_v58 = vld [vmem:[#allocation26_spill] sm:$0xff] }
 0x15e   :  { %1191 = vst [vmem:[%s2043_s3 + $0xa0] sm:$0xff] %v1115_v22   ;;  %v542_v59 = vmax.f32 %v478_v28, 0.0  ;;  %v480_v60 = vadd.f32 %v1764_v25, %v410_v45  ;;  %v412_v34 = vmul.f32 %v1748_v21, %v2131_v0  ;;  %v413_v36 = vmul.f32 %v1748_v21, %v2132_v62 }
 0x15f   :  { %1192 = vst [vmem:[%s2043_s3 + $0xa8] sm:$0xff] %v1120_v30   ;;  %v1125_v1 = vpack.c.bf16 %v541_v8, %v540_v26  ;;  %v543_v3 = vmax.f32 %v479_v24, 0.0  ;;  %v481_v13 = vadd.f32 %v1764_v25, %v411_v32  ;;  %v414_v63 = vmul.f32 %v1748_v21, %v2133_v57 }
 0x160   :  { %v544_v4 = vmax.f32 %v480_v60, 0.0  ;;  %v482_v7 = vadd.f32 %v1764_v25, %v412_v34  ;;  %v483_v11 = vadd.f32 %v1764_v25, %v413_v36  ;;  %v415_v9 = vmul.f32 %v1748_v21, %v2134_v38 }
 0x161   :  { %1193 = vst [vmem:[%s2043_s3 + $0xb0] sm:$0xff] %v1125_v1   ;;  %v1130_v37 = vpack.c.bf16 %v543_v3, %v542_v59  ;;  %v545_v15 = vmax.f32 %v481_v13, 0.0  ;;  %v484_v6 = vadd.f32 %v1764_v25, %v414_v63  ;;  %v416_v40 = vmul.f32 %v1748_v21, %v2135_v29 }
 0x162   :  { %v546_v19 = vmax.f32 %v482_v7, 0.0  ;;  %v547_v17 = vmax.f32 %v483_v11, 0.0  ;;  %v485_v61 = vadd.f32 %v1764_v25, %v415_v9  ;;  %v417_v42 = vmul.f32 %v1748_v21, %v2136_v12 }
 0x163   :  { %1194 = vst [vmem:[%s2043_s3 + $0xb8] sm:$0xff] %v1130_v37   ;;  %v1135_v23 = vpack.c.bf16 %v545_v15, %v544_v4  ;;  %v548_v49 = vmax.f32 %v484_v6, 0.0  ;;  %v486_v53 = vadd.f32 %v1764_v25, %v416_v40  ;;  %v418_v44 = vmul.f32 %v1748_v21, %v2137_v27 }
 0x164   :  { %v1140_v55 = vpack.c.bf16 %v547_v17, %v546_v19  ;;  %v549_v31 = vmax.f32 %v485_v61, 0.0  ;;  %v487_v51 = vadd.f32 %v1764_v25, %v417_v42  ;;  %v419_v35 = vmul.f32 %v1748_v21, %v2138_v46 }
 0x165   :  { %1195 = vst [vmem:[%s2043_s3 + $0xc0] sm:$0xff] %v1135_v23   ;;  %v550_v5 = vmax.f32 %v486_v53, 0.0  ;;  %v488_v14 = vadd.f32 %v1764_v25, %v418_v44  ;;  %v420_v16 = vmul.f32 %v1748_v21, %v2139_v48  ;;  %v421_v10 = vmul.f32 %v1748_v21, %v2140_v39 }
 0x166   :  { %1196 = vst [vmem:[%s2043_s3 + $0xc8] sm:$0xff] %v1140_v55   ;;  %v1145_v43 = vpack.c.bf16 %v549_v31, %v548_v49  ;;  %v551_v2 = vmax.f32 %v487_v51, 0.0  ;;  %v489_v41 = vadd.f32 %v1764_v25, %v419_v35  ;;  %v422_v52 = vmul.f32 %v1748_v21, %v2141_v50 }
 0x167   :  { %v552_v47 = vmax.f32 %v488_v14, 0.0  ;;  %v490_v18 = vadd.f32 %v1764_v25, %v420_v16  ;;  %v491_v20 = vadd.f32 %v1764_v25, %v421_v10  ;;  %v423_v54 = vmul.f32 %v1748_v21, %v2142_v33 }
 0x168   :  { %1197 = vst [vmem:[%s2043_s3 + $0xd0] sm:$0xff] %v1145_v43   ;;  %v1150_v22 = vpack.c.bf16 %v551_v2, %v550_v5  ;;  %v553_v26 = vmax.f32 %v489_v41, 0.0  ;;  %v492_v28 = vadd.f32 %v1764_v25, %v422_v52  ;;  %v424_v45 = vmul.f32 %v1748_v21, %v2143_v56 }
 0x169   :  { %v554_v30 = vmax.f32 %v490_v18, 0.0  ;;  %v555_v8 = vmax.f32 %v491_v20, 0.0  ;;  %v493_v24 = vadd.f32 %v1764_v25, %v423_v54  ;;  %v425_v32 = vmul.f32 %v1748_v21, %v2144_v58 }
 0x16a   :  { %1198 = vst [vmem:[%s2043_s3 + $0xd8] sm:$0xff] %v1150_v22   ;;  %v1155_v59 = vpack.c.bf16 %v553_v26, %v552_v47  ;;  %v556_v60 = vmax.f32 %v492_v28, 0.0  ;;  %v494_v0 = vadd.f32 %v1764_v25, %v424_v45 }
 0x16b   :  { %v1160_v34 = vpack.c.bf16 %v555_v8, %v554_v30  ;;  %v557_v62 = vmax.f32 %v493_v24, 0.0  ;;  %v495_v36 = vadd.f32 %v1764_v25, %v425_v32 }
 0x16c   :  { %1199 = vst [vmem:[%s2043_s3 + $0xe0] sm:$0xff] %v1155_v59   ;;  %v558_v1 = vmax.f32 %v494_v0, 0.0 }
 0x16d   :  { %1200 = vst [vmem:[%s2043_s3 + $0xe8] sm:$0xff] %v1160_v34   ;;  %v1165_v21 = vpack.c.bf16 %v557_v62, %v556_v60  ;;  %v559_v3 = vmax.f32 %v495_v36, 0.0 }
 0x16f   :  { %1201 = vst [vmem:[%s2043_s3 + $0xf0] sm:$0xff] %v1165_v21   ;;  %v1170_v13 = vpack.c.bf16 %v559_v3, %v558_v1 }
 0x171   :  { %1202 = vst [vmem:[%s2043_s3 + $0xf8] sm:$0xff] %v1170_v13  }

// kernel: gta_g_forward.19
= control target key start
LH: loop header
LB: loop body
LE: loop exit
PB: predicated region body
PF: predicated region fallthrough
CT: control target
= control target key end

     0   :  { %s88_s0 = inlined_call_operand.vmem [shape: f32[48,128], index: 0, kind: input, shape index: {}]   ;;  %s89_s1 = inlined_call_operand.vmem [shape: f32[48,128], index: 1, kind: output, shape index: {}]  }
   0x1   :  { %v8_v0 = vld [vmem:[%s88_s0] sm:$0xff]  ;;  %v9_v1 = vld [vmem:[%s88_s0 + $0x8] sm:$0xff]  ;;  %v10_v2 = vld [vmem:[%s88_s0 + $0x10] sm:$0xff] }
   0x2   :  { %30 = vtanh.f32 %v8_v0  ;;  %v11_v3 = vld [vmem:[%s88_s0 + $0x18] sm:$0xff]  ;;  %v12_v4 = vld [vmem:[%s88_s0 + $0x20] sm:$0xff]  ;;  %v13_v5 = vld [vmem:[%s88_s0 + $0x28] sm:$0xff] }
   0x3   :  { %32 = vtanh.f32 %v9_v1 }
   0x4   :  { %34 = vtanh.f32 %v10_v2 }
   0x5   :  { %36 = vtanh.f32 %v11_v3 }
   0x6   :  { %38 = vtanh.f32 %v12_v4 }
   0x7   :  { %40 = vtanh.f32 %v13_v5 }
   0xf   :  { %v31_v6 = vpop.eup %30 }
  0x10   :  { %v33_v7 = vpop.eup %32  ;;  %20 = vst [vmem:[%s89_s1] sm:$0xff] %v31_v6 }
  0x11   :  { %v35_v8 = vpop.eup %34  ;;  %21 = vst [vmem:[%s89_s1 + $0x8] sm:$0xff] %v33_v7 }
  0x12   :  { %v37_v9 = vpop.eup %36  ;;  %22 = vst [vmem:[%s89_s1 + $0x10] sm:$0xff] %v35_v8 }
  0x13   :  { %v39_v10 = vpop.eup %38  ;;  %23 = vst [vmem:[%s89_s1 + $0x18] sm:$0xff] %v37_v9 }
  0x14   :  { %v41_v11 = vpop.eup %40  ;;  %24 = vst [vmem:[%s89_s1 + $0x20] sm:$0xff] %v39_v10 }
  0x15   :  { %25 = vst [vmem:[%s89_s1 + $0x28] sm:$0xff] %v41_v11 }

</bundles_post_ra>
